<compile_context>
chip_gen: v7x
topology: tpu7x:2x2x1
jax: 0.10.0
libtpu: 0.0.40
codegen_flags: <defaults>
</compile_context>

<pallas_src>
import functools

import jax
import jax.numpy as jnp
from jax.experimental import pallas as pl
from jax.experimental.pallas import tpu as pltpu

LN_EPS = 1e-5  # torch.nn.LayerNorm default eps


def _round_up(x, m):
    return (x + m - 1) // m * m


def _pick_vmem_limit_bytes():
    """Size the scoped-VMEM request for the generation instead of hardcoding."""
    try:
        phys = int(pltpu.get_tpu_info().vmem_capacity_bytes)
    except Exception:
        phys = 64 * 1024 * 1024          # conservative (v7x) fallback
    return max(32 * 1024 * 1024, min((phys * 3) // 4, 112 * 1024 * 1024))


# ---------------------------------------------------------------------------
# Fused kernel
# ---------------------------------------------------------------------------
def _masked_ln_relu(h, gamma, beta, mask, d_real):
    """LayerNorm over the d_real real lanes selected by `mask`, then ReLU.

    gamma/beta are zero on padded lanes, so padded lanes stay exactly zero and
    the 128-lane layout is preserved for the next matmuls."""
    inv_d = 1.0 / d_real
    hm = h * mask
    mean = jnp.sum(hm, axis=-1, keepdims=True) * inv_d
    diff = (hm - mean) * mask
    var = jnp.sum(diff * diff, axis=-1, keepdims=True) * inv_d
    hn = diff * jax.lax.rsqrt(var + LN_EPS)
    return jnp.maximum(hn * gamma + beta, 0.0)


def fused_gnn_kernel(xc_ref, xp_ref, a_ref, dinv_ref, mask_ref,
                     wpre_ref, bpre_ref, gpre_ref, btpre_ref,
                     wrel_ref, brel_ref, wroot_ref, lng_ref, lnb_ref,
                     o_ref, h_buf, acc,
                     *, dh, tm, tk, n_pad, a_resident):
    l = pl.program_id(0)              # GraphConv layer        (sequential)
    i = pl.program_id(1)              # destination-row tile   (sequential)
    k = pl.program_id(2)              # source/reduction tile  (innermost)
    nk = pl.num_programs(2)

    cur = l % 2                       # ping-pong halves of the bf16 h buffer
    cur_base = cur * n_pad
    nxt_base = (1 - cur) * n_pad
    row0 = pl.multiple_of(i * tm, tm)
    col0 = pl.multiple_of(k * tk, tk)
    mask = mask_ref[...]              # (1, dpad) resident lane mask

    # ---- pre-MP (Linear -> LN -> ReLU) per source tile, overlapped with the
    #      layer-0 / i==0 aggregation sweep (no serial whole-graph prologue). --
    @pl.when((l == 0) & (i == 0))
    def _():
        h0 = jnp.dot(xp_ref[...], wpre_ref[...],
                     preferred_element_type=jnp.float32) + bpre_ref[...]
        h0 = _masked_ln_relu(h0, gpre_ref[...], btpre_ref[...], mask, dh)
        h_buf[pl.ds(pl.multiple_of(cur_base + col0, tk), tk), :] = (
            h0.astype(jnp.bfloat16))

    # ---- mean aggregation: acc += A[i, k] @ h[k]  (int8->bf16 A, bf16 h) -----
    @pl.when(k == 0)
    def _():
        acc[...] = jnp.zeros_like(acc)

    if a_resident:
        a_tile = a_ref[pl.ds(row0, tm), pl.ds(col0, tk)]
    else:
        a_tile = a_ref[...]
    h_k = h_buf[pl.ds(pl.multiple_of(cur_base + col0, tk), tk), :]
    acc[...] += jnp.dot(a_tile.astype(jnp.bfloat16), h_k,
                        preferred_element_type=jnp.float32)

    # ---- finalize: exact f32 1/deg, GraphConv combine, LN + ReLU, concat -----
    @pl.when(k == nk - 1)
    def _():
        agg = acc[...] * dinv_ref[...]                     # exact mean (f32)
        h_i = h_buf[pl.ds(pl.multiple_of(cur_base + row0, tm), tm), :]
        h = (jnp.dot(agg.astype(jnp.bfloat16), wrel_ref[...],
                     preferred_element_type=jnp.float32)
             + brel_ref[...]
             + jnp.dot(h_i, wroot_ref[...],
                       preferred_element_type=jnp.float32))
        h = _masked_ln_relu(h, lng_ref[...], lnb_ref[...], mask, dh)
        h_buf[pl.ds(pl.multiple_of(nxt_base + row0, tm), tm), :] = (
            h.astype(jnp.bfloat16))
        # concat(x, h) written at EVERY layer so the revisited output block is
        # never flushed uninitialized; the last layer's write is the result.
        o_ref[...] = xc_ref[...] + h


# ---------------------------------------------------------------------------
# Wrapper: padding, adjacency, parameter packing, pallas_call
# ---------------------------------------------------------------------------
def build_adjacency(edge_index, n_pad):
    """A[dst, src] = exact edge count (int8), inv_deg[dst] = 1/in_deg (f32).

    Zero-in-degree rows get inv_deg = 0 (PyG scatter-mean convention).
    TODO(synk): int8 caps parallel-edge multiplicity at 127."""
    src, dst = edge_index[0], edge_index[1]
    counts = jnp.zeros((n_pad, n_pad), jnp.float32).at[dst, src].add(1.0)
    deg = jnp.sum(counts, axis=1, keepdims=True)
    inv_deg = jnp.where(deg > 0, 1.0 / jnp.where(deg > 0, deg, 1.0), 0.0)
    return counts.astype(jnp.int8), inv_deg


def _pad_mat(w, dpad, r0, c0):
    return jnp.zeros((dpad, dpad), jnp.float32).at[
        r0:r0 + w.shape[0], c0:c0 + w.shape[1]].set(w)


def _pad_vec(v, dpad, c0):
    v = v.reshape(1, -1)
    return jnp.zeros((1, dpad), jnp.float32).at[:, c0:c0 + v.shape[1]].set(v)


def hetero_gnn_encoder_forward(x, edge_index, params, num_layers, *,
                               tile_m=128, tile_k=128, a_resident=None,
                               a_resident_max_bytes=4 * 1024 * 1024):
    """Returns batch.x after the encoder: concat(original x, final hidden)."""
    n, din = x.shape
    dh = params["pre_w"].shape[1]
    col = din                                   # hidden lanes: [din, din + dh)
    dpad = _round_up(din + dh, 128)             # lane-dense working width
    tm, tk = tile_m, tile_k
    n_pad = _round_up(n, max(tm, tk))

    a, inv_deg = build_adjacency(edge_index, n_pad)
    if a_resident is None:
        # Keep A resident across all layers when it (double-buffered) fits.
        a_resident = 2 * n_pad * n_pad <= a_resident_max_bytes

    x_pad = jnp.zeros((n_pad, dpad), jnp.float32).at[:n, :din].set(x)
    lane_mask = jnp.zeros((1, dpad), jnp.float32).at[:, col:col + dh].set(1.0)

    # pre-MP params, padded into the 128-lane / offset-column layout
    w_pre = _pad_mat(params["pre_w"], dpad, 0, col)
    b_pre = _pad_vec(params["pre_b"], dpad, col)
    g_pre = _pad_vec(params["pre_ln_g"], dpad, col)
    bt_pre = _pad_vec(params["pre_ln_b"], dpad, col)

    # GraphConv params stacked over layers; matmul weights in bf16 (MXU rate)
    w_rel = jnp.stack([_pad_mat(p["w_rel"], dpad, col, col)
                       for p in params["conv"]]).astype(jnp.bfloat16)
    b_rel = jnp.stack([_pad_vec(p["b_rel"], dpad, col) for p in params["conv"]])
    w_root = jnp.stack([_pad_mat(p["w_root"], dpad, col, col)
                        for p in params["conv"]]).astype(jnp.bfloat16)
    ln_g = jnp.stack([_pad_vec(p["ln_g"], dpad, col) for p in params["conv"]])
    ln_b = jnp.stack([_pad_vec(p["ln_b"], dpad, col) for p in params["conv"]])

    kernel = functools.partial(fused_gnn_kernel, dh=dh, tm=tm, tk=tk,
                               n_pad=n_pad, a_resident=a_resident)

    const = lambda l, i, k: (0, 0)
    row_tile = lambda l, i, k: (i, 0)
    # x for the pre-MP: follows k only during the (layer 0, first row-tile)
    # sweep where it is consumed; otherwise pinned to block 0 (no wasted DMA).
    pre_map = lambda l, i, k: (jnp.where((l == 0) & (i == 0), k, 0), 0)
    a_spec = (pl.BlockSpec((n_pad, n_pad), const) if a_resident
              else pl.BlockSpec((tm, tk), lambda l, i, k: (i, k)))
    per_layer_mat = pl.BlockSpec((None, dpad, dpad), lambda l, i, k: (l, 0, 0))
    per_layer_vec = pl.BlockSpec((None, 1, dpad), lambda l, i, k: (l, 0, 0))

    out_pad = pl.pallas_call(
        kernel,
        out_shape=jax.ShapeDtypeStruct((n_pad, dpad), jnp.float32),
        grid_spec=pltpu.PrefetchScalarGridSpec(
            num_scalar_prefetch=0,
            grid=(num_layers, n_pad // tm, n_pad // tk),
            in_specs=[
                pl.BlockSpec((tm, dpad), row_tile),    # x, concat tile (row i)
                pl.BlockSpec((tk, dpad), pre_map),     # x, pre-MP tile (row k)
                a_spec,                                # A edge counts (int8)
                pl.BlockSpec((tm, 1), row_tile),       # 1/deg (f32)
                pl.BlockSpec((1, dpad), const),        # lane mask (resident)
                pl.BlockSpec((dpad, dpad), const),     # W_pre
                pl.BlockSpec((1, dpad), const),        # b_pre
                pl.BlockSpec((1, dpad), const),        # LN gamma (pre)
                pl.BlockSpec((1, dpad), const),        # LN beta  (pre)
                per_layer_mat,                         # W_rel[l]  (bf16)
                per_layer_vec,                         # b_rel[l]
                per_layer_mat,                         # W_root[l] (bf16)
                per_layer_vec,                         # LN gamma[l]
                per_layer_vec,                         # LN beta[l]
            ],
            out_specs=pl.BlockSpec((tm, dpad), row_tile),
            scratch_shapes=[
                pltpu.VMEM((2 * n_pad, dpad), jnp.bfloat16),  # h ping-pong
                pltpu.VMEM((tm, dpad), jnp.float32),          # A@h accumulator
            ]),
        compiler_params=pltpu.CompilerParams(
            # State flows through VMEM scratch across all three axes -> sequential.
            dimension_semantics=("arbitrary", "arbitrary", "arbitrary"),
            vmem_limit_bytes=_pick_vmem_limit_bytes()),
    )(x_pad, x_pad, a, inv_deg, lane_mask,
      w_pre, b_pre, g_pre, bt_pre, w_rel, b_rel, w_root, ln_g, ln_b)

    # reshape_x = False -> no final per-node-type Linear; drop padding.
    return out_pad[:n, :din + dh]


# ---------------------------------------------------------------------------
# Parameter init (matches the PyTorch module structure) + pure-JAX reference
# ---------------------------------------------------------------------------
def init_params(key, dim_in, dim_hidden, num_layers):
    ks = jax.random.split(key, 3 * num_layers + 2)
    params = {}

    def lin(k, d_in, d_out):
        lim = 1.0 / jnp.sqrt(d_in)
        return jax.random.uniform(k, (d_in, d_out), jnp.float32, -lim, lim)

    # pre-MP: Linear(dim_in -> dim_hidden, bias) + LayerNorm(dim_hidden)
    params["pre_w"] = lin(ks[0], dim_in, dim_hidden)
    params["pre_b"] = jax.random.uniform(
        ks[1], (1, dim_hidden), jnp.float32,
        -1.0 / jnp.sqrt(dim_in), 1.0 / jnp.sqrt(dim_in))
    params["pre_ln_g"] = jnp.ones((1, dim_hidden), jnp.float32)
    params["pre_ln_b"] = jnp.zeros((1, dim_hidden), jnp.float32)

    # GraphConv layers (lin_rel has bias, lin_root has none) + per-layer LN
    params["conv"] = []
    for i in range(num_layers):
        k_rel, k_b, k_root = ks[2 + 3 * i: 5 + 3 * i]
        lim = 1.0 / jnp.sqrt(dim_hidden)
        params["conv"].append({
            "w_rel": lin(k_rel, dim_hidden, dim_hidden),
            "b_rel": jax.random.uniform(k_b, (1, dim_hidden), jnp.float32,
                                        -lim, lim),
            "w_root": lin(k_root, dim_hidden, dim_hidden),
            "ln_g": jnp.ones((1, dim_hidden), jnp.float32),
            "ln_b": jnp.zeros((1, dim_hidden), jnp.float32),
        })
    return params


def _ref_ln_relu(h, g, b):
    m = jnp.mean(h, axis=-1, keepdims=True)
    v = jnp.mean((h - m) ** 2, axis=-1, keepdims=True)
    return jnp.maximum(((h - m) / jnp.sqrt(v + LN_EPS)) * g + b, 0.0)


def ref_forward(x, edge_index, params, num_layers):
    n = x.shape[0]
    src, dst = edge_index[0], edge_index[1]
    a = jnp.zeros((n, n), jnp.float32).at[dst, src].add(1.0)
    deg = jnp.sum(a, axis=1, keepdims=True)
    a = jnp.where(deg > 0, a / jnp.where(deg > 0, deg, 1.0), 0.0)
    h = _ref_ln_relu(x @ params["pre_w"] + params["pre_b"],
                     params["pre_ln_g"], params["pre_ln_b"])
    for i in range(num_layers):
        p = params["conv"][i]
        h = _ref_ln_relu((a @ h) @ p["w_rel"] + p["b_rel"] + h @ p["w_root"],
                         p["ln_g"], p["ln_b"])
    return jnp.concatenate([x, h], axis=-1)


if __name__ == "__main__":
    key = jax.random.PRNGKey(0)
    DIM_IN, DIM_PE, LAYERS = 16, 32, 2          # dim_emb = 48

    k_x, k_p, k_rest = jax.random.split(key, 3)
    params = init_params(k_p, DIM_IN, DIM_PE, LAYERS)

    # ---- test 1: tiny deterministic graph (N=8) -> resident-A path ----------
    N = 8
    x = jax.random.normal(k_x, (N, DIM_IN), jnp.float32)
    edge_index = jnp.array(
        [[0, 1, 2, 3, 4, 5, 6, 7, 0, 2, 4, 6],
         [1, 2, 3, 4, 5, 6, 7, 0, 4, 6, 0, 2]], dtype=jnp.int32)
    out = jax.block_until_ready(
        hetero_gnn_encoder_forward(x, edge_index, params, LAYERS))
    ref = ref_forward(x, edge_index, params, LAYERS)
    assert out.shape == (N, DIM_IN + DIM_PE)
    # bf16 h / bf16 weights (f32 accumulation) vs. pure-f32 reference.
    assert jnp.allclose(out, ref, atol=5e-2, rtol=5e-2), "mismatch (resident A)"

    # ---- test 2: N=200 random graph -> streamed-A path, multi-tile grid -----
    N2 = 200
    k_x2, k_e2 = jax.random.split(k_rest)
    x2 = jax.random.normal(k_x2, (N2, DIM_IN), jnp.float32)
    e2 = jax.random.randint(k_e2, (2, 4 * N2), 0, N2, dtype=jnp.int32)
    out2 = jax.block_until_ready(
        hetero_gnn_encoder_forward(x2, e2, params, LAYERS, a_resident=False))
    ref2 = ref_forward(x2, e2, params, LAYERS)
    assert out2.shape == (N2, DIM_IN + DIM_PE)
    assert jnp.allclose(out2, ref2, atol=5e-2, rtol=5e-2), "mismatch (streamed A)"

    print("KERNEL_OK")
</pallas_src>

<mosaic_0001>
module attributes {stable_mosaic.version = 11 : i64} {
  func.func @fused_gnn_kernel(%arg0: i32, %arg1: i32, %arg2: i32, %arg3: memref<128x128xf32, #tpu.memory_space<vmem>>, %arg4: memref<128x128xf32, #tpu.memory_space<vmem>>, %arg5: memref<128x128xi8, #tpu.memory_space<vmem>>, %arg6: memref<128x1xf32, #tpu.memory_space<vmem>>, %arg7: memref<1x128xf32, #tpu.memory_space<vmem>>, %arg8: memref<128x128xf32, #tpu.memory_space<vmem>>, %arg9: memref<1x128xf32, #tpu.memory_space<vmem>>, %arg10: memref<1x128xf32, #tpu.memory_space<vmem>>, %arg11: memref<1x128xf32, #tpu.memory_space<vmem>>, %arg12: memref<1x128x128xbf16, #tpu.memory_space<vmem>>, %arg13: memref<1x1x128xf32, #tpu.memory_space<vmem>>, %arg14: memref<1x128x128xbf16, #tpu.memory_space<vmem>>, %arg15: memref<1x1x128xf32, #tpu.memory_space<vmem>>, %arg16: memref<1x1x128xf32, #tpu.memory_space<vmem>>, %arg17: memref<128x128xf32, #tpu.memory_space<vmem>>, %arg18: memref<256x128xbf16, #tpu.memory_space<vmem>>, %arg19: memref<128x128xf32, #tpu.memory_space<vmem>>) attributes {dimension_semantics = [#tpu.dimension_semantics<arbitrary>, #tpu.dimension_semantics<arbitrary>, #tpu.dimension_semantics<arbitrary>], iteration_bounds = array<i64: 2, 1, 1>, scalar_prefetch = 0 : i64, scratch_operands = 2 : i64, tpu.core_type = #tpu.core_type<tc>, window_params = [{transform_indices = @transform_0, window_bounds = array<i64: 128, 128>}, {transform_indices = @transform_1, window_bounds = array<i64: 128, 128>}, {pipeline_mode = #tpu.pipeline_mode<synchronous>, transform_indices = @transform_2, window_bounds = array<i64: 128, 128>}, {transform_indices = @transform_3, window_bounds = array<i64: 128, 1>}, {pipeline_mode = #tpu.pipeline_mode<synchronous>, transform_indices = @transform_4, window_bounds = array<i64: 1, 128>}, {pipeline_mode = #tpu.pipeline_mode<synchronous>, transform_indices = @transform_5, window_bounds = array<i64: 128, 128>}, {pipeline_mode = #tpu.pipeline_mode<synchronous>, transform_indices = @transform_6, window_bounds = array<i64: 1, 128>}, {pipeline_mode = #tpu.pipeline_mode<synchronous>, transform_indices = @transform_7, window_bounds = array<i64: 1, 128>}, {pipeline_mode = #tpu.pipeline_mode<synchronous>, transform_indices = @transform_8, window_bounds = array<i64: 1, 128>}, {transform_indices = @transform_9, window_bounds = array<i64: 1, 128, 128>}, {transform_indices = @transform_10, window_bounds = array<i64: 1, 1, 128>}, {transform_indices = @transform_11, window_bounds = array<i64: 1, 128, 128>}, {transform_indices = @transform_12, window_bounds = array<i64: 1, 1, 128>}, {transform_indices = @transform_13, window_bounds = array<i64: 1, 1, 128>}, {transform_indices = @transform_14, window_bounds = array<i64: 128, 128>}]} {
    %c2_i32 = arith.constant 2 : i32
    %c0_i32 = arith.constant 0 : i32
    %0 = arith.cmpi eq, %c2_i32, %c0_i32 : i32
    %c1_i32 = arith.constant 1 : i32
    %1 = arith.select %0, %c1_i32, %c2_i32 : i32
    %2 = arith.remsi %arg0, %1 : i32
    %c0_i32_0 = arith.constant 0 : i32
    %3 = arith.cmpi ne, %2, %c0_i32_0 : i32
    %c0_i32_1 = arith.constant 0 : i32
    %4 = arith.cmpi slt, %2, %c0_i32_1 : i32
    %c0_i32_2 = arith.constant 0 : i32
    %5 = arith.cmpi slt, %1, %c0_i32_2 : i32
    %6 = arith.xori %4, %5 : i1
    %7 = arith.andi %6, %3 : i1
    %8 = arith.addi %2, %1 : i32
    %9 = arith.select %7, %8, %2 : i32
    %c128_i32 = arith.constant 128 : i32
    %10 = arith.muli %9, %c128_i32 : i32
    %c1_i32_3 = arith.constant 1 : i32
    %11 = arith.subi %c1_i32_3, %9 : i32
    %c128_i32_4 = arith.constant 128 : i32
    %12 = arith.muli %11, %c128_i32_4 : i32
    %c128_i32_5 = arith.constant 128 : i32
    %13 = arith.muli %arg1, %c128_i32_5 : i32
    %14 = tpu.assume_multiple %13, 128 : i32
    %c128_i32_6 = arith.constant 128 : i32
    %15 = arith.muli %arg2, %c128_i32_6 : i32
    %16 = tpu.assume_multiple %15, 128 : i32
    %c0 = arith.constant 0 : index
    %c0_7 = arith.constant 0 : index
    %17 = vector.load %arg7[%c0, %c0_7] : memref<1x128xf32, #tpu.memory_space<vmem>>, vector<1x128xf32>
    %c0_i32_8 = arith.constant 0 : i32
    %18 = arith.cmpi eq, %arg0, %c0_i32_8 : i32
    %c0_i32_9 = arith.constant 0 : i32
    %19 = arith.cmpi eq, %arg1, %c0_i32_9 : i32
    %20 = arith.andi %18, %19 : i1
    %21 = arith.extui %20 : i1 to i32
    %c0_i32_10 = arith.constant 0 : i32
    %22 = arith.cmpi ne, %21, %c0_i32_10 : i32
    scf.if %22 {
      %c0_20 = arith.constant 0 : index
      %c0_21 = arith.constant 0 : index
      %41 = vector.load %arg4[%c0_20, %c0_21] : memref<128x128xf32, #tpu.memory_space<vmem>>, vector<128x128xf32>
      %c0_22 = arith.constant 0 : index
      %c0_23 = arith.constant 0 : index
      %42 = vector.load %arg8[%c0_22, %c0_23] : memref<128x128xf32, #tpu.memory_space<vmem>>, vector<128x128xf32>
      %cst_24 = arith.constant dense<0.000000e+00> : vector<128x128xf32>
      %43 = tpu.matmul %41, %42, %cst_24 {dimension_numbers = #tpu.dot_dimension_numbers<[1], [0], [0], [1], [0, 0, 1, 1], [], []>} : vector<128x128xf32>, vector<128x128xf32>, vector<128x128xf32> -> vector<128x128xf32>
      %c0_25 = arith.constant 0 : index
      %c0_26 = arith.constant 0 : index
      %44 = vector.load %arg9[%c0_25, %c0_26] : memref<1x128xf32, #tpu.memory_space<vmem>>, vector<1x128xf32>
      %45 = vector.broadcast %44 : vector<1x128xf32> to vector<128x128xf32>
      %46 = arith.addf %43, %45 : vector<128x128xf32>
      %c0_27 = arith.constant 0 : index
      %c0_28 = arith.constant 0 : index
      %47 = vector.load %arg10[%c0_27, %c0_28] : memref<1x128xf32, #tpu.memory_space<vmem>>, vector<1x128xf32>
      %c0_29 = arith.constant 0 : index
      %c0_30 = arith.constant 0 : index
      %48 = vector.load %arg11[%c0_29, %c0_30] : memref<1x128xf32, #tpu.memory_space<vmem>>, vector<1x128xf32>
      %49 = vector.broadcast %17 : vector<1x128xf32> to vector<128x128xf32>
      %50 = arith.mulf %46, %49 : vector<128x128xf32>
      %cst_31 = arith.constant dense<0.000000e+00> : vector<128xf32>
      %51 = vector.multi_reduction <add>, %50, %cst_31 [1] : vector<128x128xf32> to vector<128xf32>
      %52 = vector.shape_cast %51 : vector<128xf32> to vector<128x1xf32>
      %cst_32 = arith.constant 3.125000e-02 : f32
      %53 = vector.broadcast %cst_32 : f32 to vector<128x1xf32>
      %54 = arith.mulf %52, %53 : vector<128x1xf32>
      %55 = vector.broadcast %54 : vector<128x1xf32> to vector<128x128xf32>
      %56 = arith.subf %50, %55 : vector<128x128xf32>
      %57 = vector.broadcast %17 : vector<1x128xf32> to vector<128x128xf32>
      %58 = arith.mulf %56, %57 : vector<128x128xf32>
      %59 = arith.mulf %58, %58 : vector<128x128xf32>
      %cst_33 = arith.constant dense<0.000000e+00> : vector<128xf32>
      %60 = vector.multi_reduction <add>, %59, %cst_33 [1] : vector<128x128xf32> to vector<128xf32>
      %61 = vector.shape_cast %60 : vector<128xf32> to vector<128x1xf32>
      %cst_34 = arith.constant 3.125000e-02 : f32
      %62 = vector.broadcast %cst_34 : f32 to vector<128x1xf32>
      %63 = arith.mulf %61, %62 : vector<128x1xf32>
      %cst_35 = arith.constant 9.99999974E-6 : f32
      %64 = vector.broadcast %cst_35 : f32 to vector<128x1xf32>
      %65 = arith.addf %63, %64 : vector<128x1xf32>
      %66 = math.rsqrt %65 : vector<128x1xf32>
      %67 = vector.broadcast %66 : vector<128x1xf32> to vector<128x128xf32>
      %68 = arith.mulf %58, %67 : vector<128x128xf32>
      %69 = vector.broadcast %47 : vector<1x128xf32> to vector<128x128xf32>
      %70 = arith.mulf %68, %69 : vector<128x128xf32>
      %71 = vector.broadcast %48 : vector<1x128xf32> to vector<128x128xf32>
      %72 = arith.addf %70, %71 : vector<128x128xf32>
      %cst_36 = arith.constant 0.000000e+00 : f32
      %73 = vector.broadcast %cst_36 : f32 to vector<128x128xf32>
      %74 = arith.maximumf %72, %73 : vector<128x128xf32>
      %75 = arith.truncf %74 : vector<128x128xf32> to vector<128x128xbf16>
      %76 = arith.addi %10, %16 : i32
      %77 = tpu.assume_multiple %76, 128 : i32
      %78 = arith.index_cast %77 : i32 to index
      %c0_37 = arith.constant 0 : index
      %79 = vector.load %arg18[%78, %c0_37] : memref<256x128xbf16, #tpu.memory_space<vmem>>, vector<128x128xbf16>
      tpu.vector_store %arg18[%78, %c0_37], %75 {strides = array<i32>} : memref<256x128xbf16, #tpu.memory_space<vmem>>, vector<128x128xbf16>,
    } else {
    }
    %c0_i32_11 = arith.constant 0 : i32
    %23 = arith.cmpi eq, %arg2, %c0_i32_11 : i32
    %24 = arith.extui %23 : i1 to i32
    %c0_i32_12 = arith.constant 0 : i32
    %25 = arith.cmpi ne, %24, %c0_i32_12 : i32
    scf.if %25 {
      %cst_20 = arith.constant 0.000000e+00 : f32
      %41 = vector.broadcast %cst_20 : f32 to vector<128x128xf32>
      %c0_21 = arith.constant 0 : index
      %c0_22 = arith.constant 0 : index
      %42 = vector.load %arg19[%c0_21, %c0_22] : memref<128x128xf32, #tpu.memory_space<vmem>>, vector<128x128xf32>
      tpu.vector_store %arg19[%c0_21, %c0_22], %41 {strides = array<i32>} : memref<128x128xf32, #tpu.memory_space<vmem>>, vector<128x128xf32>,
    } else {
    }
    %26 = arith.index_cast %14 : i32 to index
    %27 = arith.index_cast %16 : i32 to index
    %28 = vector.load %arg5[%26, %27] : memref<128x128xi8, #tpu.memory_space<vmem>>, vector<128x128xi8>
    %29 = arith.addi %10, %16 : i32
    %30 = tpu.assume_multiple %29, 128 : i32
    %31 = arith.index_cast %30 : i32 to index
    %c0_13 = arith.constant 0 : index
    %32 = vector.load %arg18[%31, %c0_13] : memref<256x128xbf16, #tpu.memory_space<vmem>>, vector<128x128xbf16>
    %c0_14 = arith.constant 0 : index
    %c0_15 = arith.constant 0 : index
    %33 = vector.load %arg19[%c0_14, %c0_15] : memref<128x128xf32, #tpu.memory_space<vmem>>, vector<128x128xf32>
    %34 = arith.sitofp %28 : vector<128x128xi8> to vector<128x128xbf16>
    %cst = arith.constant dense<0.000000e+00> : vector<128x128xf32>
    %35 = tpu.matmul %34, %32, %cst {dimension_numbers = #tpu.dot_dimension_numbers<[1], [0], [0], [1], [0, 0, 1, 1], [], []>} : vector<128x128xbf16>, vector<128x128xbf16>, vector<128x128xf32> -> vector<128x128xf32>
    %36 = arith.addf %33, %35 : vector<128x128xf32>
    %c0_16 = arith.constant 0 : index
    %c0_17 = arith.constant 0 : index
    %37 = vector.load %arg19[%c0_16, %c0_17] : memref<128x128xf32, #tpu.memory_space<vmem>>, vector<128x128xf32>
    tpu.vector_store %arg19[%c0_16, %c0_17], %36 {strides = array<i32>} : memref<128x128xf32, #tpu.memory_space<vmem>>, vector<128x128xf32>,
    %c0_i32_18 = arith.constant 0 : i32
    %38 = arith.cmpi eq, %arg2, %c0_i32_18 : i32
    %39 = arith.extui %38 : i1 to i32
    %c0_i32_19 = arith.constant 0 : i32
    %40 = arith.cmpi ne, %39, %c0_i32_19 : i32
    scf.if %40 {
      %c0_20 = arith.constant 0 : index
      %c0_21 = arith.constant 0 : index
      %41 = vector.load %arg19[%c0_20, %c0_21] : memref<128x128xf32, #tpu.memory_space<vmem>>, vector<128x128xf32>
      %c0_22 = arith.constant 0 : index
      %c0_23 = arith.constant 0 : index
      %42 = vector.load %arg6[%c0_22, %c0_23] : memref<128x1xf32, #tpu.memory_space<vmem>>, vector<128x1xf32>
      %43 = vector.broadcast %42 : vector<128x1xf32> to vector<128x128xf32>
      %44 = arith.mulf %41, %43 : vector<128x128xf32>
      %45 = arith.addi %10, %14 : i32
      %46 = tpu.assume_multiple %45, 128 : i32
      %47 = arith.index_cast %46 : i32 to index
      %c0_24 = arith.constant 0 : index
      %48 = vector.load %arg18[%47, %c0_24] : memref<256x128xbf16, #tpu.memory_space<vmem>>, vector<128x128xbf16>
      %49 = arith.truncf %44 : vector<128x128xf32> to vector<128x128xbf16>
      %c0_25 = arith.constant 0 : index
      %c0_26 = arith.constant 0 : index
      %c0_27 = arith.constant 0 : index
      %50 = vector.load %arg12[%c0_25, %c0_26, %c0_27] : memref<1x128x128xbf16, #tpu.memory_space<vmem>>, vector<1x128x128xbf16>
      %51 = vector.shape_cast %50 : vector<1x128x128xbf16> to vector<128x128xbf16>
      %cst_28 = arith.constant dense<0.000000e+00> : vector<128x128xf32>
      %52 = tpu.matmul %49, %51, %cst_28 {dimension_numbers = #tpu.dot_dimension_numbers<[1], [0], [0], [1], [0, 0, 1, 1], [], []>} : vector<128x128xbf16>, vector<128x128xbf16>, vector<128x128xf32> -> vector<128x128xf32>
      %c0_29 = arith.constant 0 : index
      %c0_30 = arith.constant 0 : index
      %c0_31 = arith.constant 0 : index
      %53 = vector.load %arg13[%c0_29, %c0_30, %c0_31] : memref<1x1x128xf32, #tpu.memory_space<vmem>>, vector<1x1x128xf32>
      %54 = vector.shape_cast %53 : vector<1x1x128xf32> to vector<1x128xf32>
      %55 = vector.broadcast %54 : vector<1x128xf32> to vector<128x128xf32>
      %56 = arith.addf %52, %55 : vector<128x128xf32>
      %c0_32 = arith.constant 0 : index
      %c0_33 = arith.constant 0 : index
      %c0_34 = arith.constant 0 : index
      %57 = vector.load %arg14[%c0_32, %c0_33, %c0_34] : memref<1x128x128xbf16, #tpu.memory_space<vmem>>, vector<1x128x128xbf16>
      %58 = vector.shape_cast %57 : vector<1x128x128xbf16> to vector<128x128xbf16>
      %cst_35 = arith.constant dense<0.000000e+00> : vector<128x128xf32>
      %59 = tpu.matmul %48, %58, %cst_35 {dimension_numbers = #tpu.dot_dimension_numbers<[1], [0], [0], [1], [0, 0, 1, 1], [], []>} : vector<128x128xbf16>, vector<128x128xbf16>, vector<128x128xf32> -> vector<128x128xf32>
      %60 = arith.addf %56, %59 : vector<128x128xf32>
      %c0_36 = arith.constant 0 : index
      %c0_37 = arith.constant 0 : index
      %c0_38 = arith.constant 0 : index
      %61 = vector.load %arg15[%c0_36, %c0_37, %c0_38] : memref<1x1x128xf32, #tpu.memory_space<vmem>>, vector<1x1x128xf32>
      %62 = vector.shape_cast %61 : vector<1x1x128xf32> to vector<1x128xf32>
      %c0_39 = arith.constant 0 : index
      %c0_40 = arith.constant 0 : index
      %c0_41 = arith.constant 0 : index
      %63 = vector.load %arg16[%c0_39, %c0_40, %c0_41] : memref<1x1x128xf32, #tpu.memory_space<vmem>>, vector<1x1x128xf32>
      %64 = vector.shape_cast %63 : vector<1x1x128xf32> to vector<1x128xf32>
      %65 = vector.broadcast %17 : vector<1x128xf32> to vector<128x128xf32>
      %66 = arith.mulf %60, %65 : vector<128x128xf32>
      %cst_42 = arith.constant dense<0.000000e+00> : vector<128xf32>
      %67 = vector.multi_reduction <add>, %66, %cst_42 [1] : vector<128x128xf32> to vector<128xf32>
      %68 = vector.shape_cast %67 : vector<128xf32> to vector<128x1xf32>
      %cst_43 = arith.constant 3.125000e-02 : f32
      %69 = vector.broadcast %cst_43 : f32 to vector<128x1xf32>
      %70 = arith.mulf %68, %69 : vector<128x1xf32>
      %71 = vector.broadcast %70 : vector<128x1xf32> to vector<128x128xf32>
      %72 = arith.subf %66, %71 : vector<128x128xf32>
      %73 = vector.broadcast %17 : vector<1x128xf32> to vector<128x128xf32>
      %74 = arith.mulf %72, %73 : vector<128x128xf32>
      %75 = arith.mulf %74, %74 : vector<128x128xf32>
      %cst_44 = arith.constant dense<0.000000e+00> : vector<128xf32>
      %76 = vector.multi_reduction <add>, %75, %cst_44 [1] : vector<128x128xf32> to vector<128xf32>
      %77 = vector.shape_cast %76 : vector<128xf32> to vector<128x1xf32>
      %cst_45 = arith.constant 3.125000e-02 : f32
      %78 = vector.broadcast %cst_45 : f32 to vector<128x1xf32>
      %79 = arith.mulf %77, %78 : vector<128x1xf32>
      %cst_46 = arith.constant 9.99999974E-6 : f32
      %80 = vector.broadcast %cst_46 : f32 to vector<128x1xf32>
      %81 = arith.addf %79, %80 : vector<128x1xf32>
      %82 = math.rsqrt %81 : vector<128x1xf32>
      %83 = vector.broadcast %82 : vector<128x1xf32> to vector<128x128xf32>
      %84 = arith.mulf %74, %83 : vector<128x128xf32>
      %85 = vector.broadcast %62 : vector<1x128xf32> to vector<128x128xf32>
      %86 = arith.mulf %84, %85 : vector<128x128xf32>
      %87 = vector.broadcast %64 : vector<1x128xf32> to vector<128x128xf32>
      %88 = arith.addf %86, %87 : vector<128x128xf32>
      %cst_47 = arith.constant 0.000000e+00 : f32
      %89 = vector.broadcast %cst_47 : f32 to vector<128x128xf32>
      %90 = arith.maximumf %88, %89 : vector<128x128xf32>
      %91 = arith.truncf %90 : vector<128x128xf32> to vector<128x128xbf16>
      %92 = arith.addi %12, %14 : i32
      %93 = tpu.assume_multiple %92, 128 : i32
      %94 = arith.index_cast %93 : i32 to index
      %c0_48 = arith.constant 0 : index
      %95 = vector.load %arg18[%94, %c0_48] : memref<256x128xbf16, #tpu.memory_space<vmem>>, vector<128x128xbf16>
      tpu.vector_store %arg18[%94, %c0_48], %91 {strides = array<i32>} : memref<256x128xbf16, #tpu.memory_space<vmem>>, vector<128x128xbf16>,
      %c0_49 = arith.constant 0 : index
      %c0_50 = arith.constant 0 : index
      %96 = vector.load %arg3[%c0_49, %c0_50] : memref<128x128xf32, #tpu.memory_space<vmem>>, vector<128x128xf32>
      %97 = arith.addf %96, %90 : vector<128x128xf32>
      %c0_51 = arith.constant 0 : index
      %c0_52 = arith.constant 0 : index
      %98 = vector.load %arg17[%c0_51, %c0_52] : memref<128x128xf32, #tpu.memory_space<vmem>>, vector<128x128xf32>
      tpu.vector_store %arg17[%c0_51, %c0_52], %97 {strides = array<i32>} : memref<128x128xf32, #tpu.memory_space<vmem>>, vector<128x128xf32>,
    } else {
    }
    return
  }
  func.func @transform_0(%arg0: i32, %arg1: i32, %arg2: i32) -> (i32, i32) {
    %c0_i32 = arith.constant 0 : i32
    %c0_i32_0 = arith.constant 0 : i32
    return %arg1, %c0_i32 : i32, i32
  }
  func.func @transform_1(%arg0: i32, %arg1: i32, %arg2: i32) -> (i32, i32) {
    %c0_i32 = arith.constant 0 : i32
    %0 = arith.cmpi eq, %arg0, %c0_i32 : i32
    %c0_i32_0 = arith.constant 0 : i32
    %1 = arith.cmpi eq, %arg1, %c0_i32_0 : i32
    %2 = arith.andi %0, %1 : i1
    %c0_i32_1 = arith.constant 0 : i32
    %3 = arith.select %2, %arg2, %c0_i32_1 : i32
    %c0_i32_2 = arith.constant 0 : i32
    %c0_i32_3 = arith.constant 0 : i32
    return %3, %c0_i32_2 : i32, i32
  }
  func.func @transform_2(%arg0: i32, %arg1: i32, %arg2: i32) -> (i32, i32) {
    %c0_i32 = arith.constant 0 : i32
    %c0_i32_0 = arith.constant 0 : i32
    %c0_i32_1 = arith.constant 0 : i32
    return %c0_i32, %c0_i32_0 : i32, i32
  }
  func.func @transform_3(%arg0: i32, %arg1: i32, %arg2: i32) -> (i32, i32) {
    %c0_i32 = arith.constant 0 : i32
    %c0_i32_0 = arith.constant 0 : i32
    return %arg1, %c0_i32 : i32, i32
  }
  func.func @transform_4(%arg0: i32, %arg1: i32, %arg2: i32) -> (i32, i32) {
    %c0_i32 = arith.constant 0 : i32
    %c0_i32_0 = arith.constant 0 : i32
    %c0_i32_1 = arith.constant 0 : i32
    return %c0_i32, %c0_i32_0 : i32, i32
  }
  func.func @transform_5(%arg0: i32, %arg1: i32, %arg2: i32) -> (i32, i32) {
    %c0_i32 = arith.constant 0 : i32
    %c0_i32_0 = arith.constant 0 : i32
    %c0_i32_1 = arith.constant 0 : i32
    return %c0_i32, %c0_i32_0 : i32, i32
  }
  func.func @transform_6(%arg0: i32, %arg1: i32, %arg2: i32) -> (i32, i32) {
    %c0_i32 = arith.constant 0 : i32
    %c0_i32_0 = arith.constant 0 : i32
    %c0_i32_1 = arith.constant 0 : i32
    return %c0_i32, %c0_i32_0 : i32, i32
  }
  func.func @transform_7(%arg0: i32, %arg1: i32, %arg2: i32) -> (i32, i32) {
    %c0_i32 = arith.constant 0 : i32
    %c0_i32_0 = arith.constant 0 : i32
    %c0_i32_1 = arith.constant 0 : i32
    return %c0_i32, %c0_i32_0 : i32, i32
  }
  func.func @transform_8(%arg0: i32, %arg1: i32, %arg2: i32) -> (i32, i32) {
    %c0_i32 = arith.constant 0 : i32
    %c0_i32_0 = arith.constant 0 : i32
    %c0_i32_1 = arith.constant 0 : i32
    return %c0_i32, %c0_i32_0 : i32, i32
  }
  func.func @transform_9(%arg0: i32, %arg1: i32, %arg2: i32) -> (i32, i32, i32) {
    %c0_i32 = arith.constant 0 : i32
    %c0_i32_0 = arith.constant 0 : i32
    %c0_i32_1 = arith.constant 0 : i32
    return %arg0, %c0_i32, %c0_i32_0 : i32, i32, i32
  }
  func.func @transform_10(%arg0: i32, %arg1: i32, %arg2: i32) -> (i32, i32, i32) {
    %c0_i32 = arith.constant 0 : i32
    %c0_i32_0 = arith.constant 0 : i32
    %c0_i32_1 = arith.constant 0 : i32
    return %arg0, %c0_i32, %c0_i32_0 : i32, i32, i32
  }
  func.func @transform_11(%arg0: i32, %arg1: i32, %arg2: i32) -> (i32, i32, i32) {
    %c0_i32 = arith.constant 0 : i32
    %c0_i32_0 = arith.constant 0 : i32
    %c0_i32_1 = arith.constant 0 : i32
    return %arg0, %c0_i32, %c0_i32_0 : i32, i32, i32
  }
  func.func @transform_12(%arg0: i32, %arg1: i32, %arg2: i32) -> (i32, i32, i32) {
    %c0_i32 = arith.constant 0 : i32
    %c0_i32_0 = arith.constant 0 : i32
    %c0_i32_1 = arith.constant 0 : i32
    return %arg0, %c0_i32, %c0_i32_0 : i32, i32, i32
  }
  func.func @transform_13(%arg0: i32, %arg1: i32, %arg2: i32) -> (i32, i32, i32) {
    %c0_i32 = arith.constant 0 : i32
    %c0_i32_0 = arith.constant 0 : i32
    %c0_i32_1 = arith.constant 0 : i32
    return %arg0, %c0_i32, %c0_i32_0 : i32, i32, i32
  }
  func.func @transform_14(%arg0: i32, %arg1: i32, %arg2: i32) -> (i32, i32) {
    %c0_i32 = arith.constant 0 : i32
    %c0_i32_0 = arith.constant 0 : i32
    return %arg1, %c0_i32 : i32, i32
  }
}

</mosaic_0001>

<bundles_post_ra>
// kernel: tpu_custom_call.1
= control target key start
LH: loop header
LB: loop body
LE: loop exit
PB: predicated region body
PF: predicated region fallthrough
CT: control target
= control target key end

     0   :  { %s4405_s0 = inlined_call_operand.vmem [shape: f32[128,128], index: 0, kind: input, shape index: {}]   ;;  %s4406_s1 = inlined_call_operand.hbm [shape: f32[128,128], index: 1, kind: input, shape index: {}]   ;;  %s4407_s2 = inlined_call_operand.hbm [shape: s8[128,128], index: 2, kind: input, shape index: {}]   ;;  %s4408_s3 = inlined_call_operand.vmem [shape: f32[128,1], index: 3, kind: input, shape index: {}]   ;;  %s4409_s4 = inlined_call_operand.vmem [shape: f32[1,128], index: 4, kind: input, shape index: {}]   ;;  %s4410_s5 = inlined_call_operand.hbm [shape: f32[128,128], index: 5, kind: input, shape index: {}]   ;;  %s4411_s6 = inlined_call_operand.vmem [shape: f32[1,128], index: 6, kind: input, shape index: {}]   ;;  %s4412_s7 = inlined_call_operand.vmem [shape: f32[1,128], index: 7, kind: input, shape index: {}]   ;;  %s4413_s8 = inlined_call_operand.vmem [shape: f32[1,128], index: 8, kind: input, shape index: {}]   ;;  %s4414_s9 = inlined_call_operand.hbm [shape: bf16[2,128,128], index: 9, kind: input, shape index: {}]   ;;  %s4415_s10 = inlined_call_operand.vmem [shape: f32[2,1,128], index: 10, kind: input, shape index: {}]   ;;  %s4416_s11 = inlined_call_operand.hbm [shape: bf16[2,128,128], index: 11, kind: input, shape index: {}]   ;;  %s4417_s12 = inlined_call_operand.vmem [shape: f32[2,1,128], index: 12, kind: input, shape index: {}]   ;;  %s4418_s13 = inlined_call_operand.vmem [shape: f32[2,1,128], index: 13, kind: input, shape index: {}]   ;;  %s4419_s14 = inlined_call_operand.hbm [shape: f32[128,128], index: 14, kind: output, shape index: {}]  }
   0x1   :  { %4439 = sst [smem:[#allocation21_spill]] %s4405_s0 }
   0x2   :  { %4440 = sst [smem:[#allocation22_spill]] %s4407_s2 }
   0x3   :  { %4441 = sst [smem:[#allocation23_spill]] %s4408_s3 }
   0x4   :  { %4442 = sst [smem:[#allocation24_spill]] %s4409_s4 }
   0x5   :  { %4443 = sst [smem:[#allocation25_spill]] %s4411_s6 }
   0x6   :  { %4444 = sst [smem:[#allocation26_spill]] %s4412_s7 }
   0x7   :  { %4445 = sst [smem:[#allocation27_spill]] %s4413_s8 }
   0x8   :  { %4446 = sst [smem:[#allocation28_spill]] %s4414_s9 }
   0x9   :  { %4447 = sst [smem:[#allocation29_spill]] %s4415_s10 }
   0xa   :  { %4448 = sst [smem:[#allocation30_spill]] %s4417_s12 }
   0xb   :  { %4449 = sst [smem:[#allocation31_spill]] %s4418_s13 }
   0xc   :  { %4450 = sst [smem:[#allocation32_spill]] %s4419_s14 }
   0xd   :  { %19 = vsyncpa [#allocation5], 0 }
   0xe   :  { %21 = vsyncpa [#allocation5 + $0x1], 0 }
   0xf   :  { %22 = vsyncpa [#allocation8], 0 }
  0x10   :  { %23 = vsyncpa [#allocation11], 0 }
  0x11   :  { %25 = vsyncpa [#allocation11 + $0x1], 0 }
  0x12   :  { %26 = vsyncpa [#allocation6], 0  ;;  %s3365_s29 = smov 0   ;;  %s3367_s30 = smov 0  }
  0x13   :  { %s3369_s15 = smov 0   ;;  %s3371_s16 = smov 0  }
  0x14   :  { %s3373_s17 = smov 0   ;;  %s3375_s18 = smov 0  }
  0x15 LB: > { %4451 = sst [smem:[#allocation18_spill]] %s3263_s15  ;;  %s3394_s19 = sadd.s32 4294967295, %s3275_s18   ;;  %s3275_s18 = sphi %s3375_s18, %s32_s18   ;;  %s3271_s17 = sphi %s3373_s17, %s4496_s17   ;;  %s3267_s16 = sphi %s3371_s16, %s4495_s16   ;;  %s3263_s15 = sphi %s3369_s15, %s4491_s15   ;;  %s3259_s30 = sphi %s3367_s30, %s4494_s30   ;;  %s3255_s29 = sphi %s3365_s29, %s4493_s29  }
  0x16   : > { %p285_p0 = scmp.ne.s32.totalorder %s3259_s30, %s3255_s29  ;;  %p4421_p1 = scmp.eq.s32.totalorder %s3394_s19, 0 }
  0x17   : > { %p2466_p2 = scmp.ge.s32.totalorder %s3275_s18, 1  ;;  %p426_p3 = scmp.lt.s32.totalorder %s3275_s18, 3 }
  0x18   : > { %p3402_p4 = por %p4421_p1, %p285_p0  ;;  %s3277_s22 = smov [#allocation7]  }
  0x19   : > { %p3406_p5 = pnand %p2466_p2, %p426_p3  ;;  %s447_s23 = sshll.u32 %s3277_s22, 4  ;;  %s448_s23 = int_to_ptr.vmem [resolvable:$true] %s447_s23 }
  0x1a   : > { %s4452_s20 = scalar_select %p3402_p4, 1, 0 }
  0x1b   : > { %s4453_s21 = scalar_select %p3406_p5, 1, 0 }
  0x1c   : > { %p2876_p6 = pneg %p3406_p5  ;;  %s4455_s2 = sld [smem:[#allocation22_spill]] }
  0x1e   : > { %p3414_p7 = pnand %p2876_p6, %p4421_p1 }
  0x20   : > { %p4434_p9 = pneg %p3414_p7 }
  0x22   : > { %s3043_s27 = scalar_lea.hbm %s4455_s2, 512 }
  0x23   : > { %p3044_p8 = scmp.ne.s32.totalorder %s4455_s2, %s3043_s27  ;;  %p3050_p12 = scmp.lt.u32.totalorder %s3043_s27, %s4455_s2 }
  0x25   : > { %p3046_p10 = pnand %p4434_p9, %p3044_p8 }
  0x27   : > { %p3047_p11 = pneg %p3046_p10 }
  0x29   : > { %p3052_p13 = pnand %p3050_p12, %p3047_p11 }
  0x2b   : > { %3055 = shalt.err (!%p3052_p13)
}
  0x2c   : > { %s3056_s25 = scalar_lea.vmem %s448_s23, 512  ;;  %p3064_p6 = scmp.lt.s32.totalorder %s448_s23, %s448_s23 }
  0x2d   : > { %p3057_p0 = scmp.ne.s32.totalorder %s448_s23, %s3056_s25  ;;  %p3065_p1 = scmp.lt.s32.totalorder %s3056_s25, %s3056_s25 }
  0x2f   : > { %p3059_p2 = pnand %p3057_p0, %p4434_p9  ;;  %p3066_p4 = por %p3065_p1, %p3064_p6 }
  0x31   : > { %p3060_p3 = pneg %p3059_p2 }
  0x33   : > { %p3067_p5 = pnand %p3066_p4, %p3060_p3 }
  0x35   : > { %3070 = shalt.err (!%p3067_p5)
}
  0x36   : > { %s4426_s26 = smov 128   ;;  %s4428_s14 = smov 8  }
  0x37   : > { %2879 = dma.hbm_to_vmem [thread:$0]  (!%p3414_p7), %s4455_s2, 512, %s448_s23, [#allocation8], %s4426_s26, %s4426_s26, %s4428_s14  }
  0x38   : > { %s51_s29 = sadd.s32 1, %s3271_s17  ;;  %s272_s22 = sadd.s32 1, %s3263_s15 }
  0x39   : > { %p53_p1 = scmp.ge.s32.totalorder %s51_s29, 2  ;;  %p279_p4 = scmp.ne.s32.totalorder %s3263_s15, %s3259_s30 }
  0x3a   : > { %p4433_p5 = scmp.eq.s32.totalorder %s3275_s18, 0  ;;  %p4432_p8 = scmp.lt.s32.totalorder %s3275_s18, 2 }
  0x3b   : > { %s4498_s29 = smov (%p53_p1, %s51_s29), 0  ;;  %s521_s25 = sand.u32 1, %s3275_s18  }
  0x3c   : > { %4456 = sst [smem:[#allocation19_spill]] %s4498_s29  ;;  %p281_p10 = por %p4433_p5, %p279_p4 }
  0x3d   : > { %s269_s0 = ssub.s32 %s3271_s17, %s4498_s29  ;;  %s523_s3 = sand.u32 1, %s3263_s15  }
  0x3e   : > { %p270_p11 = scmp.eq.s32.totalorder %s269_s0, 0  ;;  %s3457_s27 = sshll.u32 %s523_s3, 6 }
  0x3f   : > { %s4431_s23 = sshll.u32 %s3271_s17, 10  ;;  %s4458_s9 = sld [smem:[#allocation28_spill]] }
  0x40   : > { %s3461_s28 = scalar_select %p270_p11, %s3263_s15, %s272_s22  }
  0x41   : > { %s525_s8 = scalar_lea.vmem [#allocation10], %s3457_s27  ;;  %p3473_p12 = pnand %p4432_p8, %p281_p10 }
  0x42   : > { %4457 = sst [smem:[#allocation20_spill]] %s3461_s28  ;;  %s532_s29 = sshll.u32 %s525_s8, 4  ;;  %s3477_s29 = int_to_ptr.vmem [resolvable:$true] %s532_s29 }
  0x43   : > { %s4459_s0 = scalar_select %p3473_p12, 1, 0 }
  0x44   : > { %s3479_s3 = scalar_lea.sflag [#allocation11], %s521_s25  ;;  %p4436_p0 = pneg %p3473_p12 }
  0x45   : > { %s3468_s2 = scalar_lea.hbm %s4458_s9, %s4431_s23  ;;  %s3076_s22 = scalar_lea.hbm %s4458_s9, 2048 }
  0x46   : > { %s3071_s26 = scalar_lea.hbm %s3468_s2, 1024  ;;  %p3077_p6 = scmp.lt.u32.totalorder %s3468_s2, %s4458_s9 }
  0x47   : > { %p3072_p13 = scmp.ne.s32.totalorder %s3468_s2, %s3071_s26  ;;  %p3078_p1 = scmp.lt.u32.totalorder %s3076_s22, %s3071_s26 }
  0x48   : > { %p3080_p10 = scmp.lt.u32.totalorder %s3071_s26, %s3468_s2 }
  0x49   : > { %p3074_p2 = pnand %p4436_p0, %p3072_p13  ;;  %p3079_p4 = por %p3078_p1, %p3077_p6 }
  0x4b   : > { %p3075_p3 = pneg %p3074_p2  ;;  %p3081_p11 = por %p3080_p10, %p3079_p4 }
  0x4d   : > { %p3082_p8 = pnand %p3081_p11, %p3075_p3 }
  0x4f   : > { %3085 = shalt.err (!%p3082_p8)
}
  0x50   : > { %s3086_s25 = scalar_lea.vmem %s3477_s29, 1024  ;;  %s3280_s8 = smov [#allocation10]  }
  0x51   : > { %p3087_p13 = scmp.ne.s32.totalorder %s3477_s29, %s3086_s25  ;;  %s3091_s14 = sshll.u32 %s3280_s8, 4  ;;  %s3092_s14 = int_to_ptr.vmem [resolvable:$false] %s3091_s14 }
  0x52   : > { %s3093_s23 = scalar_lea.vmem %s3092_s14, 2048  ;;  %p3094_p9 = scmp.lt.s32.totalorder %s3477_s29, %s3092_s14 }
  0x53   : > { %p3089_p2 = pnand %p3087_p13, %p4436_p0  ;;  %p3095_p6 = scmp.lt.s32.totalorder %s3093_s23, %s3086_s25 }
  0x55   : > { %p3090_p5 = pneg %p3089_p2  ;;  %p3096_p1 = por %p3095_p6, %p3094_p9 }
  0x57   : > { %p3097_p4 = pnand %p3096_p1, %p3090_p5 }
  0x59   : > { %3100 = shalt.err (!%p3097_p4)
}
  0x5a   : > { %s3281_s28 = smov 64   ;;  %s3282_s26 = smov 4  }
  0x5b   : > { %2889 = dma.hbm_to_vmem [thread:$0]  (!%p3473_p12), %s3468_s2, 1024, %s3477_s29, %s3479_s3, %s3281_s28, %s3281_s28, %s3282_s26  }
  0x5c   : > { %s4460_s22 = sshll.u32 %s3271_s17, 10  ;;  %s552_s23 = scalar_lea.vmem [#allocation12], %s3457_s27 }
  0x5d   : > { %s3515_s14 = scalar_lea.hbm %s4416_s11, %s4460_s22  ;;  %s559_s9 = sshll.u32 %s552_s23, 4  ;;  %s3549_s9 = int_to_ptr.vmem [resolvable:$true] %s559_s9 }
  0x5e   : > { %s3283_s15 = smov [#allocation9]   ;;  %s3101_s13 = scalar_lea.hbm %s4410_s5, 2048 }
  0x5f   : > { %s472_s7 = sshll.u32 %s3283_s15, 4  ;;  %p3102_p9 = scmp.ne.s32.totalorder %s4410_s5, %s3101_s13  ;;  %s473_s7 = int_to_ptr.vmem [resolvable:$true] %s472_s7 }
  0x60   : > { %p4461_p5 = pneg %p3414_p7  ;;  %p3108_p10 = scmp.lt.u32.totalorder %s3101_s13, %s4410_s5 }
  0x62   : > { %p3104_p8 = pnand %p3102_p9, %p4461_p5 }
  0x64   : > { %p3105_p3 = pneg %p3104_p8 }
  0x66   : > { %p3110_p11 = pnand %p3108_p10, %p3105_p3 }
  0x68   : > { %3113 = shalt.err (!%p3110_p11)
}
  0x69   : > { %s3114_s15 = scalar_lea.vmem %s473_s7, 2048  ;;  %p4462_p2 = pmov %p4461_p5 }
  0x6a   : > { %p3115_p13 = scmp.ne.s32.totalorder %s473_s7, %s3114_s15  ;;  %p3122_p4 = scmp.lt.s32.totalorder %s473_s7, %s473_s7 }
  0x6b   : > { %p3123_p0 = scmp.lt.s32.totalorder %s3114_s15, %s3114_s15 }
  0x6c   : > { %p3117_p6 = pnand %p3115_p13, %p4462_p2 }
  0x6d   : > { %p3124_p12 = por %p3123_p0, %p3122_p4 }
  0x6e   : > { %p3118_p1 = pneg %p3117_p6 }
  0x70   : > { %p3125_p5 = pnand %p3124_p12, %p3118_p1 }
  0x72   : > { %3128 = shalt.err (!%p3125_p5)
}
  0x73   : > { %s4463_s4 = smov 8   ;;  %s4464_s6 = smov 128  }
  0x74   : > { %2882 = dma.hbm_to_vmem [thread:$0]  (!%p3414_p7), %s4410_s5, 2048, %s473_s7, [#allocation8], %s4464_s6, %s4464_s6, %s4463_s4  }
  0x75   : > { %s3284_s13 = smov [#allocation4]   ;;  %p4465_p9 = scmp.eq.s32.totalorder %s3275_s18, 0 }
  0x76   : > { %s511_s27 = sshll.u32 %s3284_s13, 4  ;;  %p4466_p8 = scmp.lt.s32.totalorder %s3275_s18, 2  ;;  %s512_s27 = int_to_ptr.vmem [resolvable:$true] %s511_s27 }
  0x77   : > { %s3129_s25 = scalar_lea.hbm %s4406_s1, 2048 }
  0x78   : > { %p3545_p3 = pnand %p4466_p8, %p4465_p9  ;;  %p3130_p7 = scmp.ne.s32.totalorder %s4406_s1, %s3129_s25 }
  0x79   : > { %p3136_p11 = scmp.lt.u32.totalorder %s3129_s25, %s4406_s1 }
  0x7a   : > { %p3131_p12 = pneg %p3545_p3 }
  0x7c   : > { %p3132_p0 = pnand %p3131_p12, %p3130_p7 }
  0x7e   : > { %p3133_p10 = pneg %p3132_p0 }
  0x80   : > { %p3138_p13 = pnand %p3136_p11, %p3133_p10 }
  0x82   : > { %3141 = shalt.err (!%p3138_p13)
}
  0x83   : > { %s3142_s15 = scalar_lea.vmem %s512_s27, 2048  ;;  %s3149_s10 = scalar_lea.vmem %s512_s27, 4096 }
  0x84   : > { %p3143_p2 = scmp.ne.s32.totalorder %s512_s27, %s3142_s15  ;;  %p3150_p4 = scmp.lt.s32.totalorder %s512_s27, %s512_s27 }
  0x85   : > { %p3151_p5 = scmp.lt.s32.totalorder %s3149_s10, %s3142_s15 }
  0x86   : > { %p3145_p6 = pnand %p3143_p2, %p3131_p12 }
  0x87   : > { %p3152_p9 = por %p3151_p5, %p3150_p4 }
  0x88   : > { %p3146_p1 = pneg %p3145_p6 }
  0x8a   : > { %p3153_p8 = pnand %p3152_p9, %p3146_p1 }
  0x8c   : > { %3156 = shalt.err (!%p3153_p8)
}
  0x8d   : > { %2886 = dma.hbm_to_vmem [thread:$0]  (!%p3545_p3), %s4406_s1, 2048, %s512_s27, [#allocation5], %s4464_s6, %s4464_s6, %s4463_s4  }
  0x8e   : > { %s3157_s24 = scalar_lea.hbm %s3515_s14, 1024  ;;  %p4468_p12 = scmp.ne.s32.totalorder %s4459_s0, 0 }
  0x8f   : > { %p3158_p7 = scmp.ne.s32.totalorder %s3515_s14, %s3157_s24  ;;  %s3162_s25 = scalar_lea.hbm %s4416_s11, 2048 }
  0x90   : > { %p4469_p0 = pneg %p4468_p12  ;;  %p3163_p13 = scmp.lt.u32.totalorder %s3515_s14, %s4416_s11 }
  0x91   : > { %p3164_p2 = scmp.lt.u32.totalorder %s3162_s25, %s3157_s24  ;;  %p3166_p1 = scmp.lt.u32.totalorder %s3157_s24, %s3515_s14 }
  0x92   : > { %p3160_p10 = pnand %p3158_p7, %p4469_p0 }
  0x93   : > { %p3165_p6 = por %p3164_p2, %p3163_p13 }
  0x94   : > { %p3161_p11 = pneg %p3160_p10 }
  0x95   : > { %p3167_p4 = por %p3166_p1, %p3165_p6 }
  0x97   : > { %p3168_p5 = pnand %p3167_p4, %p3161_p11 }
  0x99   : > { %3171 = shalt.err (!%p3168_p5)
}
  0x9a   : > { %s3172_s4 = scalar_lea.vmem %s3549_s9, 1024  ;;  %p4470_p9 = pmov %p4469_p0 }
  0x9b   : > { %p3173_p3 = scmp.ne.s32.totalorder %s3549_s9, %s3172_s4  ;;  %s3285_s6 = smov [#allocation12]  }
  0x9c   : > { %s3177_s27 = sshll.u32 %s3285_s6, 4  ;;  %s3178_s27 = int_to_ptr.vmem [resolvable:$false] %s3177_s27 }
  0x9d   : > { %p3175_p8 = pnand %p3173_p3, %p4470_p9  ;;  %s3179_s7 = scalar_lea.vmem %s3178_s27, 2048 }
  0x9e   : > { %p3180_p0 = scmp.lt.s32.totalorder %s3549_s9, %s3178_s27  ;;  %p3181_p10 = scmp.lt.s32.totalorder %s3179_s7, %s3172_s4 }
  0x9f   : > { %p3176_p7 = pneg %p3175_p8 }
  0xa0   : > { %p3182_p13 = por %p3181_p10, %p3180_p0 }
  0xa2   : > { %p3183_p2 = pnand %p3182_p13, %p3176_p7 }
  0xa4   : > { %3186 = shalt.err (!%p3183_p2)
}
  0xa5   : > { %2892 = dma.hbm_to_vmem [thread:$0]  (!%p4468_p12), %s3515_s14, 1024, %s3549_s9, %s3479_s3, %s3281_s28, %s3281_s28, %s3282_s26  }
  0xa6   : > { %p4471_p11 = scmp.ne.s32.totalorder %s4453_s21, 0 }
  0xa7   : > { %p4472_p6 = scmp.eq.s32.totalorder (!%p4471_p11), %s3394_s19, 0 }
  0xa8   : > { %583 = sbr.rel (%p4471_p11) target bundleno = 1653 (0x675), region = 76 }
  0xaf   : > { %3238 = dma.done.wait (%p4472_p6), [#allocation5], 2048   ;;  %p4473_p1 = pmov %p4472_p6 }
  0xb1   : > { %3240 = vsyncadd (%p4473_p1), [#allocation5], 4294965248  ;;  %p4474_p4 = pmov %p4473_p1 }
  0xb2   : > { %p4475_p5 = pmov %p4473_p1 }
  0xb3   : > { %3242 = dma.done.wait (%p4474_p4), [#allocation8], 2560  }
  0xb4   : > { %3244 = vsyncadd (%p4475_p5), [#allocation8], 4294964736  ;;  %s602_s0 = sand.u32 1, %s3394_s19   ;;  %s604_s9 = sand.u32 1, %s3259_s30  }
  0xb5   : > { %s2484_s3 = sshll.u32 %s604_s9, 6  ;;  %s603_s21 = scalar_lea.sflag [#allocation11], %s602_s0 }
  0xb6   : > { %s3609_s28 = scalar_lea.vmem [#allocation10], %s2484_s3  ;;  %p4476_p12 = scmp.ne.s32.totalorder %s4452_s20, 0 }
  0xb8   : > { %3246 = dma.done.wait (%p4476_p12), %s603_s21, 2048  }
  0xb9   : > { %3248 = vsyncadd (%p4476_p12), %s603_s21, 4294965248  ;;  %p702_p3 = scmp.lt.s32.totalorder %s3267_s16, 1  ;;  %p713_p9 = scmp.lt.s32.totalorder %s3267_s16, 0 }
  0xba   : > { %s714_s26 = ssub.s32 0, %s3267_s16  ;;  %p731_p8 = scmp.eq.s32.totalorder %s3267_s16, 0 }
  0xbb   : > { %s3619_s14 = scalar_select %p702_p3, %s3267_s16, 1 }
  0xbc   : > { %s2486_s29 = smin.u32 %s3267_s16, %s714_s26  ;;  %s4477_s20 = sld [smem:[#allocation29_spill]]  ;;  %v753_v1 = vld [vmem:[#allocation9] sm:$0xff] (%p731_p8)  ;;  %v754_v2 = vld [vmem:[#allocation9 + $0x8] sm:$0xff] (%p731_p8)  ;;  %v755_v3 = vld [vmem:[#allocation9 + $0x10] sm:$0xff] (%p731_p8)  ;;  %v924_v41 = vlaneseq (%p731_p8) }
  0xbd   : > { %s4478_s8 = sld [smem:[#allocation30_spill]]  ;;  %s4479_s2 = sld [smem:[#allocation31_spill]]  ;;  %v2760_v4 = vpack.c.bf16 (%p731_p8), %v754_v2, %v753_v1  ;;  %v756_v5 = vld [vmem:[#allocation9 + $0x18] sm:$0xff] (%p731_p8)  ;;  %v757_v7 = vld [vmem:[#allocation9 + $0x20] sm:$0xff] (%p731_p8)  ;;  %v758_v8 = vld [vmem:[#allocation9 + $0x28] sm:$0xff] (%p731_p8) }
  0xbe   : > { %s716_s6 = sand.u32 1, %s2486_s29   ;;  %s4480_s9 = sld [smem:[#allocation24_spill]]  ;;  %v2764_v6 = vpack.c.bf16 (%p731_p8), %v756_v5, %v755_v3  ;;  %v2768_v9 = vpack.c.bf16 (%p731_p8), %v758_v8, %v757_v7  ;;  %v737_v10 = vld [vmem:[#allocation4] sm:$0xff] (%p731_p8)  ;;  %v759_v12 = vld [vmem:[#allocation9 + $0x30] sm:$0xff] (%p731_p8)  ;;  %v760_v13 = vld [vmem:[#allocation9 + $0x38] sm:$0xff] (%p731_p8)  ;;  %v925_v42 = vshrl.u32 (%p731_p8), %v924_v41, 7 }
  0xbf   : > { %s717_s27 = ssub.s32 0, %s716_s6  ;;  %2761 = vmatprep.subr.bf16.mxu0 (%p731_p8), %v2760_v4  ;;  %2792 = vmatprep.subr.bf16.mxu1 (%p731_p8), %v2760_v4  ;;  %v745_v11 = vld [vmem:[#allocation4 + $0x40] sm:$0xff] (%p731_p8)  ;;  %v2772_v14 = vpack.c.bf16 (%p731_p8), %v760_v13, %v759_v12  ;;  %v762_v16 = vld [vmem:[#allocation9 + $0x48] sm:$0xff] (%p731_p8)  ;;  %v763_v18 = vld [vmem:[#allocation9 + $0x50] sm:$0xff] (%p731_p8)  ;;  %s4481_s29 = sld [smem:[#allocation25_spill]] (%p731_p8) }
  0xc0   : > { %s4500_s27 = smov (!%p713_p9, %s717_s27), %s716_s6  ;;  %736 = sbr.rel (!%p731_p8) target bundleno = 791 (0x317), region = 100 }
  0xc1   : > { %p2488_p7 = scmp.lt.s32.totalorder %s4500_s27, 0  ;;  %s723_s21 = sadd.s32 2, %s4500_s27  ;;  %2763 = vmatpush3.bf16.msra.mxu0 (%p731_p8), %v2760_v4  ;;  %2800 = vmatpush3.bf16.msra.mxu1 (%p731_p8), %v2760_v4  ;;  %v761_v15 = vld [vmem:[#allocation9 + $0x40] sm:$0xff] (%p731_p8)  ;;  %v764_v19 = vld [vmem:[#allocation9 + $0x58] sm:$0xff] (%p731_p8)  ;;  %v766_v22 = vld [vmem:[#allocation9 + $0x68] sm:$0xff] (%p731_p8)  ;;  %v926_v43 = vsub.s32 (%p731_p8), 0, %v925_v42 }
  0xc2   : > { %s704_s12 = scalar_lea.vmem %s4477_s20, %s3619_s14  ;;  %s3646_s20 = scalar_lea.vmem [#allocation12], %s2484_s3  ;;  %2765 = vmatprep.subr.bf16.mxu0 (%p731_p8), %v2764_v6  ;;  %2793 = vmatprep.subr.bf16.mxu1 (%p731_p8), %v2764_v6  ;;  %v2776_v17 = vpack.c.bf16 (%p731_p8), %v762_v16, %v761_v15  ;;  %v2780_v20 = vpack.c.bf16 (%p731_p8), %v764_v19, %v763_v18  ;;  %v765_v21 = vld [vmem:[#allocation9 + $0x60] sm:$0xff] (%p731_p8)  ;;  %v767_v24 = vld [vmem:[#allocation9 + $0x70] sm:$0xff] (%p731_p8)  ;;  %v768_v25 = vld [vmem:[#allocation9 + $0x78] sm:$0xff] (%p731_p8) }
  0xc3   : > { %s707_s22 = scalar_lea.vmem %s4478_s8, %s3619_s14  ;;  %s710_s4 = scalar_lea.vmem %s4479_s2, %s3619_s14  ;;  %2640 = vmatprep.mubr.f32.mxu0 (%p731_p8), %v737_v10  ;;  %2652 = vmatprep.mubr.f32.mxu1 (%p731_p8), %v745_v11  ;;  %v2784_v23 = vpack.c.bf16 (%p731_p8), %v766_v22, %v765_v21  ;;  %v2788_v26 = vpack.c.bf16 (%p731_p8), %v768_v25, %v767_v24  ;;  %v738_v27 = vld [vmem:[#allocation4 + $0x8] sm:$0xff] (%p731_p8)  ;;  %v739_v29 = vld [vmem:[#allocation4 + $0x10] sm:$0xff] (%p731_p8)  ;;  %v740_v31 = vld [vmem:[#allocation4 + $0x18] sm:$0xff] (%p731_p8) }
  0xc4   : > { %v3638_v0 = vld [vmem:[%s4480_s9] sm:$0x1]  ;;  %s4502_s21 = smov (!%p2488_p7, %s723_s21), %s4500_s27  ;;  %v746_v28 = vld [vmem:[#allocation4 + $0x48] sm:$0xff] (%p731_p8)  ;;  %v747_v30 = vld [vmem:[#allocation4 + $0x50] sm:$0xff] (%p731_p8)  ;;  %s4482_s8 = sld [smem:[#allocation26_spill]] (%p731_p8) }
  0xc5   : > { %s2489_s26 = sshll.u32 %s4502_s21, 7  ;;  %s726_s15 = ssub.s32 1, %s4502_s21  ;;  %2767 = vmatpush3.bf16.msra.mxu0 (%p731_p8), %v2764_v6  ;;  %2801 = vmatpush3.bf16.msra.mxu1 (%p731_p8), %v2764_v6  ;;  %v748_v32 = vld [vmem:[#allocation4 + $0x58] sm:$0xff] (%p731_p8)  ;;  %v741_v33 = vld [vmem:[#allocation4 + $0x20] sm:$0xff] (%p731_p8)  ;;  %v742_v35 = vld [vmem:[#allocation4 + $0x28] sm:$0xff] (%p731_p8)  ;;  %v3654_v45 = vrot.slane (%p731_p8), %v3638_v0, %v926_v43 }
  0xc6   : > { %s3644_s10 = sshll.u32 %s726_s15, 7  ;;  %2769 = vmatprep.subr.bf16.mxu0 (%p731_p8), %v2768_v9  ;;  %2794 = vmatprep.subr.bf16.mxu1 (%p731_p8), %v2768_v9  ;;  %v749_v34 = vld [vmem:[#allocation4 + $0x60] sm:$0xff] (%p731_p8)  ;;  %v750_v36 = vld [vmem:[#allocation4 + $0x68] sm:$0xff] (%p731_p8)  ;;  %v743_v37 = vld [vmem:[#allocation4 + $0x30] sm:$0xff] (%p731_p8)  ;;  %s4483_s2 = sld [smem:[#allocation27_spill]] (%p731_p8) }
  0xc7   : > { %v751_v38 = vld [vmem:[#allocation4 + $0x70] sm:$0xff]  ;;  %v744_v39 = vld [vmem:[#allocation4 + $0x38] sm:$0xff]  ;;  %v2492_v44 = vld [vmem:[%s4481_s29] ss:$0 sm:$0xff]  ;;  %s3833_s6 = sshra.s32 %s2489_s26, 4 }
  0xc8   : > { %v752_v40 = vld [vmem:[#allocation4 + $0x78] sm:$0xff]  ;;  %s2495_s27 = sshll.u32 %s3833_s6, 3 }
  0xc9   : > { %2771 = vmatpush3.bf16.msra.mxu0 %v2768_v9  ;;  %2802 = vmatpush3.bf16.msra.mxu1 %v2768_v9  ;;  %s3849_s7 = scalar_lea.vmem [#allocation2], %s2495_s27 }
  0xca   : > { %2773 = vmatprep.subr.bf16.mxu0 %v2772_v14  ;;  %2795 = vmatprep.subr.bf16.mxu1 %v2772_v14 }
  0xcd   : > { %2775 = vmatpush3.bf16.msra.mxu0 %v2772_v14  ;;  %2803 = vmatpush3.bf16.msra.mxu1 %v2772_v14 }
  0xce   : > { %2777 = vmatprep.subr.bf16.mxu0 %v2776_v17  ;;  %2796 = vmatprep.subr.bf16.mxu1 %v2776_v17 }
  0xd1   : > { %2779 = vmatpush3.bf16.msra.mxu0 %v2776_v17  ;;  %2804 = vmatpush3.bf16.msra.mxu1 %v2776_v17 }
  0xd2   : > { %2781 = vmatprep.subr.bf16.mxu0 %v2780_v20  ;;  %2797 = vmatprep.subr.bf16.mxu1 %v2780_v20 }
  0xd5   : > { %2783 = vmatpush3.bf16.msra.mxu0 %v2780_v20  ;;  %2805 = vmatpush3.bf16.msra.mxu1 %v2780_v20 }
  0xd6   : > { %2785 = vmatprep.subr.bf16.mxu0 %v2784_v23  ;;  %2798 = vmatprep.subr.bf16.mxu1 %v2784_v23 }
  0xd9   : > { %2787 = vmatpush3.bf16.msra.mxu0 %v2784_v23  ;;  %2806 = vmatpush3.bf16.msra.mxu1 %v2784_v23 }
  0xda   : > { %2789 = vmatprep.subr.bf16.mxu0 %v2788_v26  ;;  %2799 = vmatprep.subr.bf16.mxu1 %v2788_v26 }
  0xdd   : > { %2791 = vmatpush3.bf16.msra.mxu0 %v2788_v26  ;;  %2807 = vmatpush3.bf16.msra.mxu1 %v2788_v26 }
  0xe0   : > { %2641 = vmatmul.mubr.f32.vlgmr.msra.gmra.mrb[0].mxu0 %v738_v27  ;;  %2653 = vmatmul.mubr.f32.vlgmr.msra.gmra.mrb[0].mxu1 %v746_v28 }
  0xe1   : > { %2643 = vmatprep.mubr.f32.mxu0 %v739_v29  ;;  %2655 = vmatprep.mubr.f32.mxu1 %v747_v30 }
  0xe4   : > { %2644 = vmatmul.mubr.f32.gmra.mrb[2].mxu0 %v740_v31  ;;  %2656 = vmatmul.mubr.f32.gmra.mrb[2].mxu1 %v748_v32 }
  0xe5   : > { %2646 = vmatprep.mubr.f32.mxu0 %v741_v33  ;;  %2658 = vmatprep.mubr.f32.mxu1 %v749_v34 }
  0xe8   : > { %2647 = vmatmul.mubr.f32.gmra.mrb[4].mxu0 %v742_v35  ;;  %2659 = vmatmul.mubr.f32.gmra.mrb[4].mxu1 %v750_v36 }
  0xe9   : > { %2649 = vmatprep.mubr.f32.mxu0 %v743_v37  ;;  %2661 = vmatprep.mubr.f32.mxu1 %v751_v38 }
  0xec   : > { %2650 = vmatmul.mubr.f32.gmra.mrb[6].mxu0 %v744_v39  ;;  %2662 = vmatmul.mubr.f32.gmra.mrb[6].mxu1 %v752_v40 }
 0x1b3   : > { %v2642_v46 = vpop.f32.mrb[0].mxu0  ;;  %v2654_v47 = vpop.f32.mrb[0].mxu1 }
 0x1b4   : > { %v848_v48 = vadd.f32 %v2642_v46, %v2492_v44  ;;  %v888_v49 = vadd.f32 %v2654_v47, %v2492_v44  ;;  %v842_v50 = vpop.f32.mrb[1].mxu0  ;;  %v882_v51 = vpop.f32.mrb[1].mxu1 }
 0x1b5   : > { %v843_v52 = vadd.f32 %v2492_v44, %v842_v50  ;;  %v883_v61 = vadd.f32 %v2492_v44, %v882_v51 }
 0x1b6   : > { %v3657_v53 = vmul.f32 %v3654_v45, %v888_v49  ;;  %v3660_v54 = vmul.f32 %v3654_v45, %v848_v48 }
 0x1b7   : > { %v2645_v55 = vpop.f32.mrb[2].mxu0  ;;  %v2657_v56 = vpop.f32.mrb[2].mxu1  ;;  %v3668_v63 = vmul.f32 %v3654_v45, %v843_v52  ;;  %v3676_v8 = vmul.f32 %v3654_v45, %v883_v61 }
 0x1b8   : > { %v858_v57 = vadd.f32 %v2645_v55, %v2492_v44  ;;  %963 = vadd.xlane.f32.xlu1 %v3657_v53  ;;  %947 = vadd.xlane.f32.xlu0 %v3660_v54  ;;  %v852_v58 = vpop.f32.mrb[3].mxu0  ;;  %v898_v59 = vadd.f32 %v2657_v56, %v2492_v44  ;;  %v892_v60 = vpop.f32.mrb[3].mxu1 }
 0x1b9   : > { %v853_v6 = vadd.f32 %v2492_v44, %v852_v58  ;;  %v893_v7 = vadd.f32 %v2492_v44, %v892_v60 }
 0x1ba   : > { %v3665_v62 = vmul.f32 %v3654_v45, %v858_v57  ;;  %v3673_v3 = vmul.f32 %v3654_v45, %v898_v59 }
 0x1bb   : > { %v2648_v1 = vpop.f32.mrb[4].mxu0  ;;  %v2660_v2 = vpop.f32.mrb[4].mxu1  ;;  %v3681_v15 = vmul.f32 %v3654_v45, %v853_v6  ;;  %v3684_v16 = vmul.f32 %v3654_v45, %v893_v7 }
 0x1bc   : > { %951 = vadd.xlane.f32.xlu1 %v3665_v62  ;;  %945 = vadd.xlane.f32.xlu0 %v3668_v63  ;;  %v862_v4 = vpop.f32.mrb[5].mxu0  ;;  %v902_v5 = vpop.f32.mrb[5].mxu1  ;;  %v868_v11 = vadd.f32 %v2648_v1, %v2492_v44  ;;  %v908_v17 = vadd.f32 %v2660_v2, %v2492_v44 }
 0x1bd   : > { %v863_v12 = vadd.f32 %v2492_v44, %v862_v4  ;;  %v903_v18 = vadd.f32 %v2492_v44, %v902_v5 }
 0x1be   : > { %v3689_v19 = vmul.f32 %v3654_v45, %v868_v11  ;;  %v3695_v21 = vmul.f32 %v3654_v45, %v908_v17 }
 0x1bf   : > { %v2651_v9 = vpop.f32.mrb[6].mxu0  ;;  %v2663_v10 = vpop.f32.mrb[6].mxu1  ;;  %v3692_v20 = vmul.f32 %v3654_v45, %v863_v12  ;;  %v3700_v24 = vmul.f32 %v3654_v45, %v903_v18 }
 0x1c0   : > { %967 = vadd.xlane.f32.xlu1 %v3673_v3  ;;  %961 = vadd.xlane.f32.xlu0 %v3676_v8  ;;  %v872_v13 = vpop.f32.mrb[7].mxu0  ;;  %v912_v14 = vpop.f32.mrb[7].mxu1  ;;  %v878_v22 = vadd.f32 %v2651_v9, %v2492_v44  ;;  %v918_v25 = vadd.f32 %v2663_v10, %v2492_v44 }
 0x1c1   : > { %v873_v23 = vadd.f32 %v2492_v44, %v872_v13  ;;  %v913_v26 = vadd.f32 %v2492_v44, %v912_v14 }
 0x1c2   : > { %v3705_v27 = vmul.f32 %v3654_v45, %v878_v22  ;;  %v3713_v29 = vmul.f32 %v3654_v45, %v918_v25 }
 0x1c3   : > { %v3708_v28 = vmul.f32 %v3654_v45, %v873_v23  ;;  %v3716_v30 = vmul.f32 %v3654_v45, %v913_v26 }
 0x1c4   : > { %949 = vadd.xlane.f32.xlu1 %v3681_v15  ;;  %965 = vadd.xlane.f32.xlu0 %v3684_v16 }
 0x1c8   : > { %955 = vadd.xlane.f32.xlu1 %v3689_v19  ;;  %953 = vadd.xlane.f32.xlu0 %v3692_v20 }
 0x1cc   : > { %971 = vadd.xlane.f32.xlu1 %v3695_v21  ;;  %969 = vadd.xlane.f32.xlu0 %v3700_v24 }
 0x1d0   : > { %959 = vadd.xlane.f32.xlu1 %v3705_v27  ;;  %957 = vadd.xlane.f32.xlu0 %v3708_v28 }
 0x1d4   : > { %975 = vadd.xlane.f32.xlu1 %v3713_v29  ;;  %973 = vadd.xlane.f32.xlu0 %v3716_v30 }
 0x245   : > { %v964_v31 = vpop.xlane.xlu1 %963  ;;  %v948_v32 = vpop.xlane.xlu0 %947 }
 0x246   : > { %v986_v33 = vmul.f32 0.03125, %v964_v31  ;;  %v978_v34 = vmul.f32 0.03125, %v948_v32 }
 0x248   : > { %v1002_v35 = vsub.f32 %v3657_v53, %v986_v33  ;;  %v994_v36 = vsub.f32 %v3660_v54, %v978_v34 }
 0x249   : > { %v952_v37 = vpop.xlane.xlu1 %951  ;;  %v946_v38 = vpop.xlane.xlu0 %945 }
 0x24a   : > { %v980_v39 = vmul.f32 0.03125, %v952_v37  ;;  %v977_v40 = vmul.f32 0.03125, %v946_v38  ;;  %v3723_v41 = vmul.f32 %v994_v36, %v3654_v45  ;;  %v3730_v46 = vmul.f32 %v1002_v35, %v3654_v45 }
 0x24c   : > { %v996_v42 = vsub.f32 %v3665_v62, %v980_v39  ;;  %v993_v43 = vsub.f32 %v3668_v63, %v977_v40  ;;  %v1026_v44 = vmul.f32 %v3723_v41, %v3723_v41  ;;  %v1034_v55 = vmul.f32 %v3730_v46, %v3730_v46 }
 0x24d   : > { %v968_v47 = vpop.xlane.xlu1 %967  ;;  %v962_v48 = vpop.xlane.xlu0 %961 }
 0x24e   : > { %v988_v49 = vmul.f32 0.03125, %v968_v47  ;;  %v985_v50 = vmul.f32 0.03125, %v962_v48  ;;  %1043 = vadd.xlane.f32.xlu1 %v1026_v44  ;;  %v3733_v51 = vmul.f32 %v993_v43, %v3654_v45  ;;  %v3736_v52 = vmul.f32 %v996_v42, %v3654_v45 }
 0x250   : > { %v1004_v53 = vsub.f32 %v3673_v3, %v988_v49  ;;  %v1001_v54 = vsub.f32 %v3676_v8, %v985_v50  ;;  %v1025_v56 = vmul.f32 %v3733_v51, %v3733_v51  ;;  %v1028_v62 = vmul.f32 %v3736_v52, %v3736_v52 }
 0x251   : > { %v950_v57 = vpop.xlane.xlu1 %949  ;;  %v966_v58 = vpop.xlane.xlu0 %965 }
 0x252   : > { %v979_v59 = vmul.f32 0.03125, %v950_v57  ;;  %v987_v60 = vmul.f32 0.03125, %v966_v58  ;;  %1059 = vadd.xlane.f32.xlu1 %v1034_v55  ;;  %1041 = vadd.xlane.f32.xlu0 %v1025_v56  ;;  %v3745_v61 = vmul.f32 %v1001_v54, %v3654_v45  ;;  %v3754_v3 = vmul.f32 %v1004_v53, %v3654_v45 }
 0x254   : > { %v995_v63 = vsub.f32 %v3681_v15, %v979_v59  ;;  %v1003_v1 = vsub.f32 %v3684_v16, %v987_v60  ;;  %v1033_v2 = vmul.f32 %v3745_v61, %v3745_v61  ;;  %v1036_v12 = vmul.f32 %v3754_v3, %v3754_v3 }
 0x255   : > { %v956_v4 = vpop.xlane.xlu1 %955  ;;  %v954_v5 = vpop.xlane.xlu0 %953 }
 0x256   : > { %v982_v6 = vmul.f32 0.03125, %v956_v4  ;;  %v981_v7 = vmul.f32 0.03125, %v954_v5  ;;  %1047 = vadd.xlane.f32.xlu1 %v1028_v62  ;;  %1057 = vadd.xlane.f32.xlu0 %v1033_v2  ;;  %v3757_v8 = vmul.f32 %v995_v63, %v3654_v45  ;;  %v3760_v9 = vmul.f32 %v1003_v1, %v3654_v45 }
 0x258   : > { %v998_v10 = vsub.f32 %v3689_v19, %v982_v6  ;;  %v997_v11 = vsub.f32 %v3692_v20, %v981_v7  ;;  %v1027_v13 = vmul.f32 %v3757_v8, %v3757_v8  ;;  %v1035_v19 = vmul.f32 %v3760_v9, %v3760_v9 }
 0x259   : > { %v972_v14 = vpop.xlane.xlu1 %971  ;;  %v970_v15 = vpop.xlane.xlu0 %969 }
 0x25a   : > { %v990_v16 = vmul.f32 0.03125, %v972_v14  ;;  %v989_v17 = vmul.f32 0.03125, %v970_v15  ;;  %1063 = vadd.xlane.f32.xlu1 %v1036_v12  ;;  %1045 = vadd.xlane.f32.xlu0 %v1027_v13  ;;  %v3769_v18 = vmul.f32 %v998_v10, %v3654_v45  ;;  %v3778_v25 = vmul.f32 %v997_v11, %v3654_v45  ;;  %v3819_v14 = vld [vmem:[%s4482_s8] ss:$0 sm:$0xff] }
 0x25c   : > { %v1006_v20 = vsub.f32 %v3695_v21, %v990_v16  ;;  %v1005_v22 = vsub.f32 %v3700_v24, %v989_v17  ;;  %v1030_v23 = vmul.f32 %v3769_v18, %v3769_v18  ;;  %v1029_v37 = vmul.f32 %v3778_v25, %v3778_v25 }
 0x25d   : > { %v960_v26 = vpop.xlane.xlu1 %959  ;;  %v958_v31 = vpop.xlane.xlu0 %957 }
 0x25e   : > { %v984_v32 = vmul.f32 0.03125, %v960_v26  ;;  %v983_v33 = vmul.f32 0.03125, %v958_v31  ;;  %1051 = vadd.xlane.f32.xlu1 %v1030_v23  ;;  %1061 = vadd.xlane.f32.xlu0 %v1035_v19  ;;  %v3781_v34 = vmul.f32 %v1006_v20, %v3654_v45  ;;  %v3784_v35 = vmul.f32 %v1005_v22, %v3654_v45 }
 0x260   : > { %v1000_v21 = vsub.f32 %v3705_v27, %v984_v32  ;;  %v999_v24 = vsub.f32 %v3708_v28, %v983_v33  ;;  %v1038_v36 = vmul.f32 %v3781_v34, %v3781_v34  ;;  %v1037_v27 = vmul.f32 %v3784_v35, %v3784_v35  ;;  %v3826_v32 = vld [vmem:[%s4483_s2] ss:$0 sm:$0xff] }
 0x261   : > { %v976_v38 = vpop.xlane.xlu1 %975  ;;  %v974_v39 = vpop.xlane.xlu0 %973 }
 0x262   : > { %v992_v40 = vmul.f32 0.03125, %v976_v38  ;;  %v991_v42 = vmul.f32 0.03125, %v974_v39  ;;  %1067 = vadd.xlane.f32.xlu1 %v1038_v36  ;;  %1049 = vadd.xlane.f32.xlu0 %v1029_v37  ;;  %v3793_v43 = vmul.f32 %v1000_v21, %v3654_v45  ;;  %v3802_v48 = vmul.f32 %v999_v24, %v3654_v45 }
 0x264   : > { %v1008_v28 = vsub.f32 %v3713_v29, %v992_v40  ;;  %v1007_v44 = vsub.f32 %v3716_v30, %v991_v42  ;;  %v1032_v47 = vmul.f32 %v3793_v43, %v3793_v43  ;;  %v1031_v53 = vmul.f32 %v3802_v48, %v3802_v48 }
 0x266   : > { %1055 = vadd.xlane.f32.xlu1 %v1032_v47  ;;  %1065 = vadd.xlane.f32.xlu0 %v1037_v27  ;;  %v3805_v49 = vmul.f32 %v1008_v28, %v3654_v45  ;;  %v3812_v29 = vmul.f32 %v1007_v44, %v3654_v45 }
 0x268   : > { %v1040_v50 = vmul.f32 %v3805_v49, %v3805_v49  ;;  %v1039_v30 = vmul.f32 %v3812_v29, %v3812_v29 }
 0x26a   : > { %1071 = vadd.xlane.f32.xlu1 %v1040_v50  ;;  %1053 = vadd.xlane.f32.xlu0 %v1031_v53 }
 0x26e   : > { %1069 = vadd.xlane.f32.xlu0 %v1039_v30 }
 0x2db   : > { %v1044_v54 = vpop.xlane.xlu1 %1043 }
 0x2dc   : > { %v1074_v55 = vmul.f32 0.03125, %v1044_v54 }
 0x2de   : > { %v1090_v56 = vadd.f32 1e-05, %v1074_v55 }
 0x2df   : > { %v1060_v57 = vpop.xlane.xlu1 %1059  ;;  %v1042_v58 = vpop.xlane.xlu0 %1041 }
 0x2e0   : > { %2961 = vrsqrt.f32 %v1090_v56  ;;  %v1082_v59 = vmul.f32 0.03125, %v1060_v57  ;;  %v1073_v60 = vmul.f32 0.03125, %v1042_v58 }
 0x2e2   : > { %v1098_v62 = vadd.f32 1e-05, %v1082_v59  ;;  %v1089_v63 = vadd.f32 1e-05, %v1073_v60 }
 0x2e3   : > { %v1048_v1 = vpop.xlane.xlu1 %1047  ;;  %v1058_v2 = vpop.xlane.xlu0 %1057 }
 0x2e4   : > { %2963 = vrsqrt.f32 %v1098_v62  ;;  %v1076_v45 = vmul.f32 0.03125, %v1048_v1  ;;  %v1081_v4 = vmul.f32 0.03125, %v1058_v2 }
 0x2e5   : > { %2965 = vrsqrt.f32 %v1089_v63 }
 0x2e6   : > { %v1092_v5 = vadd.f32 1e-05, %v1076_v45  ;;  %v1097_v6 = vadd.f32 1e-05, %v1081_v4 }
 0x2e7   : > { %v1064_v7 = vpop.xlane.xlu1 %1063  ;;  %v1046_v10 = vpop.xlane.xlu0 %1045 }
 0x2e8   : > { %2967 = vrsqrt.f32 %v1092_v5  ;;  %v1084_v11 = vmul.f32 0.03125, %v1064_v7  ;;  %v1075_v12 = vmul.f32 0.03125, %v1046_v10 }
 0x2e9   : > { %2969 = vrsqrt.f32 %v1097_v6 }
 0x2ea   : > { %v2962_v13 = vpop.eup %2961  ;;  %v1100_v15 = vadd.f32 1e-05, %v1084_v11  ;;  %v1091_v16 = vadd.f32 1e-05, %v1075_v12 }
 0x2eb   : > { %v1122_v17 = vmul.f32 %v2962_v13, %v3723_v41  ;;  %v1052_v19 = vpop.xlane.xlu1 %1051  ;;  %v1062_v20 = vpop.xlane.xlu0 %1061 }
 0x2ec   : > { %2971 = vrsqrt.f32 %v1100_v15  ;;  %v1078_v22 = vmul.f32 0.03125, %v1052_v19  ;;  %v1083_v23 = vmul.f32 0.03125, %v1062_v20 }
 0x2ed   : > { %v1144_v26 = vmul.f32 %v3819_v14, %v1122_v17  ;;  %2973 = vrsqrt.f32 %v1091_v16 }
 0x2ee   : > { %v2964_v31 = vpop.eup %2963  ;;  %v1094_v33 = vadd.f32 1e-05, %v1078_v22  ;;  %v1099_v21 = vadd.f32 1e-05, %v1083_v23 }
 0x2ef   : > { %v2966_v24 = vpop.eup %2965  ;;  %v1130_v41 = vmul.f32 %v2964_v31, %v3730_v46  ;;  %v1068_v36 = vpop.xlane.xlu1 %1067  ;;  %v1166_v42 = vadd.f32 %v3826_v32, %v1144_v26 }
 0x2f0   : > { %v1050_v37 = vpop.xlane.xlu0 %1049  ;;  %v1121_v38 = vmul.f32 %v2966_v24, %v3733_v51  ;;  %2975 = vrsqrt.f32 %v1094_v33  ;;  %v1086_v39 = vmul.f32 0.03125, %v1068_v36 }
 0x2f1   : > { %v1077_v40 = vmul.f32 0.03125, %v1050_v37  ;;  %2977 = vrsqrt.f32 %v1099_v21  ;;  %v1152_v28 = vmul.f32 %v3819_v14, %v1130_v41  ;;  %v1182_v57 = vmax.f32 %v1166_v42, 0.0 }
 0x2f2   : > { %v2968_v27 = vpop.eup %2967  ;;  %v1143_v44 = vmul.f32 %v3819_v14, %v1121_v38  ;;  %v1102_v46 = vadd.f32 1e-05, %v1086_v39 }
 0x2f3   : > { %v1093_v47 = vadd.f32 1e-05, %v1077_v40  ;;  %v2970_v50 = vpop.eup %2969  ;;  %v1124_v51 = vmul.f32 %v2968_v27, %v3736_v52  ;;  %v1056_v53 = vpop.xlane.xlu1 %1055  ;;  %v1174_v62 = vadd.f32 %v3826_v32, %v1152_v28 }
 0x2f4   : > { %v1066_v30 = vpop.xlane.xlu0 %1065  ;;  %v1165_v54 = vadd.f32 %v3826_v32, %v1143_v44  ;;  %v1129_v55 = vmul.f32 %v2970_v50, %v3745_v61  ;;  %2979 = vrsqrt.f32 %v1102_v46  ;;  %v1080_v56 = vmul.f32 0.03125, %v1056_v53 }
 0x2f5   : > { %v1146_v58 = vmul.f32 %v3819_v14, %v1124_v51  ;;  %2981 = vrsqrt.f32 %v1093_v47  ;;  %v1085_v59 = vmul.f32 0.03125, %v1066_v30  ;;  %v1190_v16 = vmax.f32 %v1174_v62, 0.0 }
 0x2f6   : > { %v2972_v60 = vpop.eup %2971  ;;  %v1181_v63 = vmax.f32 %v1165_v54, 0.0  ;;  %v1151_v52 = vmul.f32 %v3819_v14, %v1129_v55  ;;  %v1096_v1 = vadd.f32 1e-05, %v1080_v56 }
 0x2f7   : > { %v2974_v2 = vpop.eup %2973  ;;  %v1132_v45 = vmul.f32 %v2972_v60, %v3754_v3  ;;  %v1101_v4 = vadd.f32 1e-05, %v1085_v59  ;;  %v1072_v5 = vpop.xlane.xlu1 %1071  ;;  %v1168_v11 = vadd.f32 %v3826_v32, %v1146_v58 }
 0x2f8   : > { %v1054_v61 = vpop.xlane.xlu0 %1053  ;;  %v1197_v6 = vpack.c.bf16 %v1182_v57, %v1181_v63  ;;  %v1173_v7 = vadd.f32 %v3826_v32, %v1151_v52  ;;  %v1123_v10 = vmul.f32 %v2974_v2, %v3757_v8  ;;  %2983 = vrsqrt.f32 %v1096_v1 }
 0x2f9   : > { %v1154_v12 = vmul.f32 %v3819_v14, %v1132_v45  ;;  %2985 = vrsqrt.f32 %v1101_v4  ;;  %v1088_v13 = vmul.f32 0.03125, %v1072_v5  ;;  %v1079_v19 = vmul.f32 0.03125, %v1054_v61 }
 0x2fa   : > { %v2976_v15 = vpop.eup %2975  ;;  %1210 = vst [vmem:[%s3849_s7] sm:$0xff] %v1197_v6  ;;  %v1189_v3 = vmax.f32 %v1173_v7, 0.0  ;;  %v1145_v17 = vmul.f32 %v3819_v14, %v1123_v10  ;;  %v1184_v24 = vmax.f32 %v1168_v11, 0.0 }
 0x2fb   : > { %v2978_v20 = vpop.eup %2977  ;;  %v1126_v8 = vmul.f32 %v2976_v15, %v3769_v18  ;;  %v1104_v22 = vadd.f32 1e-05, %v1088_v13  ;;  %v1095_v21 = vadd.f32 1e-05, %v1079_v19  ;;  %v1176_v41 = vadd.f32 %v3826_v32, %v1154_v12 }
 0x2fc   : > { %v1070_v23 = vpop.xlane.xlu0 %1069  ;;  %v1201_v26 = vpack.c.bf16 %v1190_v16, %v1189_v3  ;;  %v1167_v31 = vadd.f32 %v3826_v32, %v1145_v17  ;;  %v1131_v33 = vmul.f32 %v2978_v20, %v3760_v9 }
 0x2fd   : > { %2987 = vrsqrt.f32 %v1104_v22  ;;  %v1087_v36 = vmul.f32 0.03125, %v1070_v23  ;;  %v1148_v39 = vmul.f32 %v3819_v14, %v1126_v8  ;;  %v1192_v46 = vmax.f32 %v1176_v41, 0.0 }
 0x2fe   : > { %v2980_v37 = vpop.eup %2979  ;;  %1214 = vst [vmem:[%s3849_s7 + $0x20] sm:$0xff] %v1201_v26  ;;  %v1183_v38 = vmax.f32 %v1167_v31, 0.0  ;;  %v1153_v18 = vmul.f32 %v3819_v14, %v1131_v33  ;;  %2989 = vrsqrt.f32 %v1095_v21 }
 0x2ff   : > { %v2982_v40 = vpop.eup %2981  ;;  %v1134_v42 = vmul.f32 %v2980_v37, %v3781_v34  ;;  %v1103_v27 = vadd.f32 1e-05, %v1087_v36  ;;  %v1170_v50 = vadd.f32 %v3826_v32, %v1148_v39 }
 0x300   : > { %v1198_v9 = vpack.c.bf16 %v1184_v24, %v1183_v38  ;;  %v1175_v28 = vadd.f32 %v3826_v32, %v1153_v18  ;;  %v1125_v44 = vmul.f32 %v2982_v40, %v3778_v25 }
 0x301   : > { %2991 = vrsqrt.f32 %v1103_v27  ;;  %v1156_v53 = vmul.f32 %v3819_v14, %v1134_v42  ;;  %v1186_v57 = vmax.f32 %v1170_v50, 0.0 }
 0x302   : > { %v2984_v47 = vpop.eup %2983  ;;  %1211 = vst [vmem:[%s3849_s7 + $0x8] sm:$0xff] %v1198_v9  ;;  %v1191_v51 = vmax.f32 %v1175_v28, 0.0  ;;  %v1147_v30 = vmul.f32 %v3819_v14, %v1125_v44 }
 0x303   : > { %v2986_v54 = vpop.eup %2985  ;;  %v1128_v34 = vmul.f32 %v2984_v47, %v3793_v43  ;;  %v1178_v58 = vadd.f32 %v3826_v32, %v1156_v53 }
 0x304   : > { %v1202_v55 = vpack.c.bf16 %v1192_v46, %v1191_v51  ;;  %v1169_v56 = vadd.f32 %v3826_v32, %v1147_v30  ;;  %v1133_v25 = vmul.f32 %v2986_v54, %v3784_v35 }
 0x305   : > { %v1150_v63 = vmul.f32 %v3819_v14, %v1128_v34  ;;  %v1194_v35 = vmax.f32 %v1178_v58, 0.0 }
 0x306   : > { %1215 = vst [vmem:[%s3849_s7 + $0x28] sm:$0xff] %v1202_v55  ;;  %v1185_v59 = vmax.f32 %v1169_v56, 0.0  ;;  %v1155_v60 = vmul.f32 %v3819_v14, %v1133_v25 }
 0x307   : > { %v2988_v62 = vpop.eup %2987  ;;  %v1172_v6 = vadd.f32 %v3826_v32, %v1150_v63 }
 0x308   : > { %v2990_v52 = vpop.eup %2989  ;;  %v1199_v1 = vpack.c.bf16 %v1186_v57, %v1185_v59  ;;  %v1177_v43 = vadd.f32 %v3826_v32, %v1155_v60  ;;  %v1136_v2 = vmul.f32 %v2988_v62, %v3805_v49 }
 0x309   : > { %v1127_v45 = vmul.f32 %v2990_v52, %v3802_v48  ;;  %v1188_v13 = vmax.f32 %v1172_v6, 0.0 }
 0x30a   : > { %1212 = vst [vmem:[%s3849_s7 + $0x10] sm:$0xff] %v1199_v1  ;;  %v1193_v4 = vmax.f32 %v1177_v43, 0.0  ;;  %v1158_v5 = vmul.f32 %v3819_v14, %v1136_v2 }
 0x30b   : > { %v2992_v61 = vpop.eup %2991  ;;  %v1149_v7 = vmul.f32 %v3819_v14, %v1127_v45 }
 0x30c   : > { %v1203_v10 = vpack.c.bf16 %v1194_v35, %v1193_v4  ;;  %v1135_v11 = vmul.f32 %v2992_v61, %v3812_v29  ;;  %v1180_v48 = vadd.f32 %v3826_v32, %v1158_v5 }
 0x30d   : > { %v1171_v12 = vadd.f32 %v3826_v32, %v1149_v7 }
 0x30e   : > { %1216 = vst [vmem:[%s3849_s7 + $0x30] sm:$0xff] %v1203_v10  ;;  %v1157_v49 = vmul.f32 %v3819_v14, %v1135_v11  ;;  %v1196_v17 = vmax.f32 %v1180_v48, 0.0 }
 0x30f   : > { %v1187_v15 = vmax.f32 %v1171_v12, 0.0 }
 0x310   : > { %v1179_v16 = vadd.f32 %v3826_v32, %v1157_v49 }
 0x311   : > { %v1200_v3 = vpack.c.bf16 %v1188_v13, %v1187_v15 }
 0x312   : > { %v1195_v19 = vmax.f32 %v1179_v16, 0.0 }
 0x313   : > { %1213 = vst [vmem:[%s3849_s7 + $0x18] sm:$0xff] %v1200_v3 }
 0x314   : > { %v1204_v20 = vpack.c.bf16 %v1196_v17, %v1195_v19 }
 0x316   : > { %1217 = vst [vmem:[%s3849_s7 + $0x38] sm:$0xff] %v1204_v20 }
 0x317 PF: > { %s1250_s0 = sshra.s32 %s2489_s26, 4  ;;  %v3891_v29 = vld [vmem:[#allocation7] sm:$0xff]  ;;  %v3286_v14 = vmov 0   ;;  %s4484_s3 = sld [smem:[#allocation23_spill]]  ;;  %v2997_v18 = vld [vmem:[%s3609_s28 + $0x8] sm:$0xff]   ;;  %v2999_v9 = vld [vmem:[%s3609_s28 + $0x10] sm:$0xff]  }
 0x318   : > { %s2496_s9 = sshll.u32 %s1250_s0, 3  ;;  %v1278_v8 = vunpack.c.l.s8.bf16 %v3891_v29  ;;  %2993 = vset.pattern.permute.xlu0 %v3286_v14  ;;  %2994 = vset.pattern.permute.xlu1 %v3286_v14  ;;  %v2995_v38 = vld [vmem:[%s3609_s28] sm:$0xff]   ;;  %v3001_v46 = vld [vmem:[%s3609_s28 + $0x18] sm:$0xff]   ;;  %v3005_v55 = vld [vmem:[%s3609_s28 + $0x28] sm:$0xff]   ;;  %v1279_v59 = vunpack.c.h.s8.bf16 %v3891_v29  ;;  %s4488_s23 = sld [smem:[#allocation21_spill]] }
 0x319   : > { %s3900_s21 = scalar_lea.vmem [#allocation2], %s2496_s9  ;;  %2696 = vmatprep.subr.bf16.mxu1 %v2995_v38  ;;  %v3003_v53 = vld [vmem:[%s3609_s28 + $0x20] sm:$0xff]   ;;  %v1246_v25 = vld [vmem:[#allocation7 + $0x8] sm:$0xff]  ;;  %v3007_v58 = vld [vmem:[%s3609_s28 + $0x30] sm:$0xff]   ;;  %s2197_s2 = sshra.s32 %s3644_s10, 4 }
 0x31a   : > { %2680 = vmatprep.mubr.bf16.mxu0 %v1278_v8  ;;  %2697 = vmatpush3.bf16.msra.mxu1 %v2995_v38  ;;  %v3990_v57 = vld [vmem:[%s3646_s20] sm:$0xff]   ;;  %v1280_v60 = vunpack.c.l.s8.bf16 %v1246_v25  ;;  %v3997_v62 = vld [vmem:[%s3646_s20 + $0x8] sm:$0xff]   ;;  %v1247_v63 = vld [vmem:[#allocation7 + $0x10] sm:$0xff]  ;;  %v1281_v1 = vunpack.c.h.s8.bf16 %v1246_v25  ;;  %s2517_s7 = sshll.u32 %s2197_s2, 3  ;;  %s3287_s15 = smov [#allocation13]  }
 0x31b   : > { %2698 = vmatprep.subr.bf16.mxu1 %v2997_v18  ;;  %v4002_v52 = vld [vmem:[%s3646_s20 + $0x10] sm:$0xff]   ;;  %v1282_v43 = vunpack.c.l.s8.bf16 %v1247_v63  ;;  %v4007_v2 = vld [vmem:[%s3646_s20 + $0x18] sm:$0xff]   ;;  %v4012_v35 = vld [vmem:[%s3646_s20 + $0x20] sm:$0xff]   ;;  %v1283_v4 = vunpack.c.h.s8.bf16 %v1247_v63  ;;  %s2266_s16 = sshll.u32 %s3287_s15, 4  ;;  %p2900_p0 = scmp.eq.s32.totalorder %s3394_s19, 1  ;;  %s2267_s16 = int_to_ptr.vmem [resolvable:$true] %s2266_s16 }
 0x31c   : > { %v1248_v45 = vld [vmem:[#allocation7 + $0x18] sm:$0xff]  ;;  %v4017_v61 = vld [vmem:[%s3646_s20 + $0x28] sm:$0xff]   ;;  %v4024_v7 = vld [vmem:[%s3646_s20 + $0x30] sm:$0xff]   ;;  %p3194_p11 = scmp.lt.s32.totalorder %s2267_s16, %s2267_s16 }
 0x31d   : > { %v1434_v32 = vld [vmem:[%s4484_s3] sm:$0xff]  ;;  %v1436_v22 = vld [vmem:[%s4484_s3 + $0x10] sm:$0xff]  ;;  %v3906_v26 = vld [vmem:[%s3900_s21 + $0x8] sm:$0xff]  ;;  %v1284_v5 = vunpack.c.l.s8.bf16 %v1248_v45  ;;  %v1285_v6 = vunpack.c.h.s8.bf16 %v1248_v45 }
 0x31e   : > { %1452 = vperm.xlu0 %2993, %v1434_v32   ;;  %1462 = vperm.xlu1 %2994, %v1436_v22   ;;  %v3903_v23 = vld [vmem:[%s3900_s21] sm:$0xff]  ;;  %v1435_v31 = vld [vmem:[%s4484_s3 + $0x8] sm:$0xff]  ;;  %v1437_v33 = vld [vmem:[%s4484_s3 + $0x18] sm:$0xff] }
 0x31f   : > { %2664 = vmatprep.subr.bf16.mxu0 %v3903_v23  ;;  %v3918_v21 = vld [vmem:[%s3900_s21 + $0x10] sm:$0xff]  ;;  %v1438_v24 = vld [vmem:[%s4484_s3 + $0x20] sm:$0xff]  ;;  %v1439_v41 = vld [vmem:[%s4484_s3 + $0x28] sm:$0xff]  ;;  %2699 = vmatpush3.bf16.msra.mxu1 %v2997_v18 }
 0x320   : > { %2665 = vmatpush3.bf16.msra.mxu0 %v3903_v23  ;;  %v3928_v36 = vld [vmem:[%s3900_s21 + $0x18] sm:$0xff]  ;;  %v1440_v37 = vld [vmem:[%s4484_s3 + $0x30] sm:$0xff]  ;;  %v3941_v40 = vld [vmem:[%s3900_s21 + $0x20] sm:$0xff]  ;;  %2700 = vmatprep.subr.bf16.mxu1 %v2999_v9 }
 0x321   : > { %2666 = vmatprep.subr.bf16.mxu0 %v3906_v26  ;;  %v1441_v39 = vld [vmem:[%s4484_s3 + $0x38] sm:$0xff]  ;;  %v1442_v42 = vld [vmem:[%s4484_s3 + $0x40] sm:$0xff]  ;;  %v1443_v27 = vld [vmem:[%s4484_s3 + $0x48] sm:$0xff] }
 0x322   : > { %1457 = vperm.xlu0 %2993, %v1435_v31   ;;  %1467 = vperm.xlu1 %2994, %v1437_v33   ;;  %v3953_v28 = vld [vmem:[%s3900_s21 + $0x28] sm:$0xff]  ;;  %v1444_v44 = vld [vmem:[%s4484_s3 + $0x50] sm:$0xff]  ;;  %v1445_v47 = vld [vmem:[%s4484_s3 + $0x58] sm:$0xff] }
 0x323   : > { %2701 = vmatpush3.bf16.msra.mxu1 %v2999_v9  ;;  %v3966_v50 = vld [vmem:[%s3900_s21 + $0x30] sm:$0xff]  ;;  %v1446_v51 = vld [vmem:[%s4484_s3 + $0x60] sm:$0xff]  ;;  %v1447_v30 = vld [vmem:[%s4484_s3 + $0x68] sm:$0xff] }
 0x324   : > { %2667 = vmatpush3.bf16.msra.mxu0 %v3906_v26  ;;  %2702 = vmatprep.subr.bf16.mxu1 %v3001_v46  ;;  %v3978_v54 = vld [vmem:[%s3900_s21 + $0x38] sm:$0xff]  ;;  %v1448_v34 = vld [vmem:[%s4484_s3 + $0x70] sm:$0xff] }
 0x325   : > { %2668 = vmatprep.subr.bf16.mxu0 %v3918_v21  ;;  %v1449_v56 = vld [vmem:[%s4484_s3 + $0x78] sm:$0xff] }
 0x326   : > { %1472 = vperm.xlu0 %2993, %v1438_v24   ;;  %1477 = vperm.xlu1 %2994, %v1439_v41   ;;  %v3009_v10 = vld [vmem:[%s3609_s28 + $0x38] sm:$0xff]  }
 0x327   : > { %2703 = vmatpush3.bf16.msra.mxu1 %v3001_v46  ;;  %v4030_v11 = vld [vmem:[%s3646_s20 + $0x38] sm:$0xff]   ;;  %s4296_s20 = scalar_lea.vmem [#allocation2], %s2517_s7 }
 0x328   : > { %2669 = vmatpush3.bf16.msra.mxu0 %v3918_v21  ;;  %2704 = vmatprep.subr.bf16.mxu1 %v3003_v53 }
 0x329   : > { %2670 = vmatprep.subr.bf16.mxu0 %v3928_v36 }
 0x32a   : > { %1482 = vperm.xlu0 %2993, %v1440_v37   ;;  %1487 = vperm.xlu1 %2994, %v1441_v39  }
 0x32b   : > { %2705 = vmatpush3.bf16.msra.mxu1 %v3003_v53 }
 0x32c   : > { %2671 = vmatpush3.bf16.msra.mxu0 %v3928_v36  ;;  %2706 = vmatprep.subr.bf16.mxu1 %v3005_v55 }
 0x32d   : > { %2672 = vmatprep.subr.bf16.mxu0 %v3941_v40 }
 0x32e   : > { %1492 = vperm.xlu0 %2993, %v1442_v42   ;;  %1497 = vperm.xlu1 %2994, %v1443_v27  }
 0x32f   : > { %2707 = vmatpush3.bf16.msra.mxu1 %v3005_v55 }
 0x330   : > { %2673 = vmatpush3.bf16.msra.mxu0 %v3941_v40  ;;  %2708 = vmatprep.subr.bf16.mxu1 %v3007_v58 }
 0x331   : > { %2674 = vmatprep.subr.bf16.mxu0 %v3953_v28 }
 0x332   : > { %1502 = vperm.xlu0 %2993, %v1444_v44   ;;  %1507 = vperm.xlu1 %2994, %v1445_v47  }
 0x333   : > { %2709 = vmatpush3.bf16.msra.mxu1 %v3007_v58 }
 0x334   : > { %2675 = vmatpush3.bf16.msra.mxu0 %v3953_v28  ;;  %2710 = vmatprep.subr.bf16.mxu1 %v3009_v10 }
 0x335   : > { %2676 = vmatprep.subr.bf16.mxu0 %v3966_v50 }
 0x336   : > { %1512 = vperm.xlu0 %2993, %v1446_v51   ;;  %1517 = vperm.xlu1 %2994, %v1447_v30  }
 0x337   : > { %2711 = vmatpush3.bf16.msra.mxu1 %v3009_v10 }
 0x338   : > { %2677 = vmatpush3.bf16.msra.mxu0 %v3966_v50  ;;  %2808 = vmatprep.subr.bf16.mxu1 %v3990_v57 }
 0x339   : > { %2678 = vmatprep.subr.bf16.mxu0 %v3978_v54 }
 0x33a   : > { %1522 = vperm.xlu0 %2993, %v1448_v34   ;;  %1527 = vperm.xlu1 %2994, %v1449_v56  }
 0x33c   : > { %2679 = vmatpush3.bf16.msra.mxu0 %v3978_v54 }
 0x33d   : > { %2728 = vmatprep.subr.bf16.mxu0 %v3990_v57 }
 0x33f   : > { %2681 = vmatmul.mubr.bf16.vlgmr.msra.gmra.mrb[0].mxu0 %v1279_v59 }
 0x340   : > { %2684 = vmatprep.mubr.bf16.mxu0 %v1280_v60  ;;  %2729 = vmatpush3.bf16.msra.mxu0 %v3990_v57 }
 0x341   : > { %2730 = vmatprep.subr.bf16.mxu0 %v3997_v62 }
 0x344   : > { %2731 = vmatpush3.bf16.msra.mxu0 %v3997_v62 }
 0x345   : > { %2732 = vmatprep.subr.bf16.mxu0 %v4002_v52 }
 0x347   : > { %2685 = vmatmul.mubr.bf16.gmra.mrb[4].mxu0 %v1281_v1 }
 0x348   : > { %2688 = vmatprep.mubr.bf16.mxu0 %v1282_v43  ;;  %2733 = vmatpush3.bf16.msra.mxu0 %v4002_v52 }
 0x349   : > { %2734 = vmatprep.subr.bf16.mxu0 %v4007_v2 }
 0x34c   : > { %2735 = vmatpush3.bf16.msra.mxu0 %v4007_v2 }
 0x34d   : > { %2736 = vmatprep.subr.bf16.mxu0 %v4012_v35 }
 0x34f   : > { %2689 = vmatmul.mubr.bf16.gmra.mrb[8].mxu0 %v1283_v4 }
 0x350   : > { %2692 = vmatprep.mubr.bf16.mxu0 %v1284_v5  ;;  %2737 = vmatpush3.bf16.msra.mxu0 %v4012_v35 }
 0x351   : > { %2738 = vmatprep.subr.bf16.mxu0 %v4017_v61 }
 0x354   : > { %2739 = vmatpush3.bf16.msra.mxu0 %v4017_v61 }
 0x355   : > { %2740 = vmatprep.subr.bf16.mxu0 %v4024_v7 }
 0x357   : > { %2693 = vmatmul.mubr.bf16.gmra.mrb[12].mxu0 %v1285_v6 }
 0x358   : > { %2744 = vmatprep.mubr.bf16.mxu0 %v3903_v23  ;;  %2741 = vmatpush3.bf16.msra.mxu0 %v4024_v7 }
 0x359   : > { %2742 = vmatprep.subr.bf16.mxu0 %v4030_v11 }
 0x35c   : > { %2743 = vmatpush3.bf16.msra.mxu0 %v4030_v11 }
 0x35f   : > { %2745 = vmatmul.mubr.bf16.vlgmr.msra.gmra.mrb[16].mxu0 %v3906_v26 }
 0x360   : > { %2748 = vmatprep.mubr.bf16.mxu0 %v3918_v21 }
 0x367   : > { %2749 = vmatmul.mubr.bf16.gmra.mrb[20].mxu0 %v3928_v36 }
 0x39d   : > { %v1453_v12 = vpop.permute.xlu0 %1452  ;;  %v1463_v48 = vpop.permute.xlu1 %1462 }
 0x3a1   : > { %v1458_v49 = vpop.permute.xlu0 %1457  ;;  %v1468_v13 = vpop.permute.xlu1 %1467 }
 0x3a5   : > { %v1473_v15 = vpop.permute.xlu0 %1472  ;;  %v1478_v16 = vpop.permute.xlu1 %1477 }
 0x3a9   : > { %v1483_v17 = vpop.permute.xlu0 %1482  ;;  %v1488_v20 = vpop.permute.xlu1 %1487 }
 0x3ad   : > { %v1493_v33 = vpop.permute.xlu0 %1492  ;;  %v1498_v21 = vpop.permute.xlu1 %1497 }
 0x3b1   : > { %v1503_v27 = vpop.permute.xlu0 %1502  ;;  %v1508_v44 = vpop.permute.xlu1 %1507 }
 0x3b5   : > { %v1513_v30 = vpop.permute.xlu0 %1512  ;;  %v1518_v25 = vpop.permute.xlu1 %1517 }
 0x3b9   : > { %v1523_v63 = vpop.permute.xlu0 %1522  ;;  %v1528_v1 = vpop.permute.xlu1 %1527 }
 0x412   : > { %v2682_v3 = vpop.f32.mrb[0].mxu0 }
 0x413   : > { %v1320_v19 = vpop.f32.mrb[1].mxu0  ;;  %v1532_v8 = vmul.f32 %v2682_v3, %v1463_v48 }
 0x414   : > { %v2683_v29 = vpop.f32.mrb[2].mxu0  ;;  %v1530_v22 = vmul.f32 %v1453_v12, %v1320_v19 }
 0x415   : > { %v1533_v14 = vmul.f32 %v2683_v29, %v1468_v13  ;;  %v1323_v32 = vpop.f32.mrb[3].mxu0 }
 0x416   : > { %v1531_v23 = vmul.f32 %v1458_v49, %v1323_v32 }
 0x417   : > { %v1560_v26 = vpack.c.bf16 %v1533_v14, %v1532_v8 }
 0x418   : > { %v1559_v31 = vpack.c.bf16 %v1531_v23, %v1530_v22 }
 0x41a   : > { %v2686_v24 = vpop.f32.mrb[4].mxu0  ;;  %2712 = vmatprep.mubr.bf16.mxu1 %v1559_v31 }
 0x41b   : > { %v1336_v41 = vpop.f32.mrb[5].mxu0  ;;  %2713 = vmatmul.mubr.bf16.vlgmr.msra.gmra.mrb[0].mxu1 %v1560_v26  ;;  %v1536_v37 = vmul.f32 %v2686_v24, %v1483_v17 }
 0x41c   : > { %2816 = vmatpush3.bf16.msra.mxu1 %v3990_v57  ;;  %v2687_v36 = vpop.f32.mrb[6].mxu0  ;;  %v1534_v18 = vmul.f32 %v1473_v15, %v1336_v41 }
 0x41d   : > { %v1537_v38 = vmul.f32 %v2687_v36, %v1488_v20  ;;  %v1339_v39 = vpop.f32.mrb[7].mxu0  ;;  %2809 = vmatprep.subr.bf16.mxu1 %v3997_v62 }
 0x41e   : > { %v1535_v42 = vmul.f32 %v1478_v16, %v1339_v39 }
 0x41f   : > { %v1562_v9 = vpack.c.bf16 %v1537_v38, %v1536_v37 }
 0x420   : > { %v1561_v46 = vpack.c.bf16 %v1535_v42, %v1534_v18  ;;  %2817 = vmatpush3.bf16.msra.mxu1 %v3997_v62 }
 0x421   : > { %2810 = vmatprep.subr.bf16.mxu1 %v4002_v52 }
 0x422   : > { %v2690_v47 = vpop.f32.mrb[8].mxu0  ;;  %2716 = vmatprep.mubr.bf16.mxu1 %v1561_v46 }
 0x423   : > { %v1352_v51 = vpop.f32.mrb[9].mxu0  ;;  %2717 = vmatmul.mubr.bf16.gmra.mrb[4].mxu1 %v1562_v9  ;;  %v1540_v34 = vmul.f32 %v2690_v47, %v1503_v27 }
 0x424   : > { %2818 = vmatpush3.bf16.msra.mxu1 %v4002_v52  ;;  %v2691_v53 = vpop.f32.mrb[10].mxu0  ;;  %v1538_v57 = vmul.f32 %v1493_v33, %v1352_v51 }
 0x425   : > { %v1541_v55 = vmul.f32 %v2691_v53, %v1508_v44  ;;  %v1355_v56 = vpop.f32.mrb[11].mxu0  ;;  %2811 = vmatprep.subr.bf16.mxu1 %v4007_v2 }
 0x426   : > { %v1539_v58 = vmul.f32 %v1498_v21, %v1355_v56 }
 0x427   : > { %v1564_v59 = vpack.c.bf16 %v1541_v55, %v1540_v34 }
 0x428   : > { %v1563_v60 = vpack.c.bf16 %v1539_v58, %v1538_v57  ;;  %2819 = vmatpush3.bf16.msra.mxu1 %v4007_v2 }
 0x429   : > { %2812 = vmatprep.subr.bf16.mxu1 %v4012_v35 }
 0x42a   : > { %v2694_v62 = vpop.f32.mrb[12].mxu0  ;;  %2720 = vmatprep.mubr.bf16.mxu1 %v1563_v60 }
 0x42b   : > { %v1368_v52 = vpop.f32.mrb[13].mxu0  ;;  %2721 = vmatmul.mubr.bf16.gmra.mrb[8].mxu1 %v1564_v59  ;;  %v1544_v45 = vmul.f32 %v2694_v62, %v1523_v63 }
 0x42c   : > { %2820 = vmatpush3.bf16.msra.mxu1 %v4012_v35  ;;  %v2695_v43 = vpop.f32.mrb[14].mxu0  ;;  %v1542_v6 = vmul.f32 %v1513_v30, %v1368_v52 }
 0x42d   : > { %v1545_v4 = vmul.f32 %v2695_v43, %v1528_v1  ;;  %v1371_v5 = vpop.f32.mrb[15].mxu0  ;;  %2813 = vmatprep.subr.bf16.mxu1 %v4017_v61 }
 0x42e   : > { %v1543_v10 = vmul.f32 %v1518_v25, %v1371_v5 }
 0x42f   : > { %v1566_v12 = vpack.c.bf16 %v1545_v4, %v1544_v45 }
 0x430   : > { %v1565_v2 = vpack.c.bf16 %v1543_v10, %v1542_v6  ;;  %2821 = vmatpush3.bf16.msra.mxu1 %v4017_v61 }
 0x431   : > { %2814 = vmatprep.subr.bf16.mxu1 %v4024_v7 }
 0x432   : > { %2724 = vmatprep.mubr.bf16.mxu1 %v1565_v2  ;;  %v2746_v35 = vpop.f32.mrb[16].mxu0 }
 0x433   : > { %2725 = vmatmul.mubr.bf16.gmra.mrb[12].mxu1 %v1566_v12  ;;  %v1833_v61 = vpop.f32.mrb[17].mxu0 }
 0x434   : > { %2822 = vmatpush3.bf16.msra.mxu1 %v4024_v7  ;;  %2752 = vmatprep.mubr.bf16.mxu1 %v3941_v40  ;;  %v2747_v48 = vpop.f32.mrb[18].mxu0  ;;  %v1915_v40 = vlaneseq }
 0x435   : > { %2815 = vmatprep.subr.bf16.mxu1 %v4030_v11  ;;  %v1836_v49 = vpop.f32.mrb[19].mxu0 }
 0x436   : > { %v1916_v3 = vshrl.u32 %v1915_v40, 7 }
 0x438   : > { %2823 = vmatpush3.bf16.msra.mxu1 %v4030_v11  ;;  %v1917_v17 = vsub.s32 0, %v1916_v3 }
 0x43a   : > { %v2750_v13 = vpop.f32.mrb[20].mxu0  ;;  %v4066_v19 = vrot.slane %v3638_v0, %v1917_v17 }
 0x43b   : > { %2753 = vmatmul.mubr.bf16.vlgmr.msra.gmra.mrb[8].mxu1 %v3953_v28  ;;  %v1849_v15 = vpop.f32.mrb[21].mxu0  ;;  %v4062_v28 = vld [vmem:[%s704_s12] ss:$0 sm:$0xff]  ;;  %s3187_s12 = scalar_lea.vmem %s2267_s16, 2048 }
 0x43c   : > { %2756 = vmatprep.mubr.bf16.mxu1 %v3966_v50  ;;  %v2751_v7 = vpop.f32.mrb[22].mxu0  ;;  %p3188_p10 = scmp.ne.s32.totalorder %s2267_s16, %s3187_s12  ;;  %p3195_p6 = scmp.lt.s32.totalorder %s3187_s12, %s3187_s12 }
 0x43d   : > { %v1852_v16 = vpop.f32.mrb[23].mxu0 }
 0x43e   : > { %p3189_p13 = pnand %p3188_p10, %p2900_p0  ;;  %p3196_p1 = por %p3195_p6, %p3194_p11 }
 0x440   : > { %p3190_p2 = pneg %p3189_p13 }
 0x442   : > { %p3197_p4 = pnand %p3196_p1, %p3190_p2 }
 0x443   : > { %2757 = vmatmul.mubr.bf16.gmra.mrb[12].mxu1 %v3978_v54 }
 0x4ee   : > { %v2714_v50 = vpop.f32.mrb[0].mxu1 }
 0x4ef   : > { %v1681_v54 = vadd.f32 %v2714_v50, %v4062_v28  ;;  %v1672_v11 = vpop.f32.mrb[1].mxu1 }
 0x4f0   : > { %v1673_v20 = vadd.f32 %v4062_v28, %v1672_v11  ;;  %v2715_v29 = vpop.f32.mrb[2].mxu1 }
 0x4f1   : > { %v1684_v8 = vadd.f32 %v2715_v29, %v4062_v28  ;;  %v1898_v14 = vadd.f32 %v2746_v35, %v1681_v54  ;;  %v1675_v32 = vpop.f32.mrb[3].mxu1 }
 0x4f2   : > { %v1676_v22 = vadd.f32 %v4062_v28, %v1675_v32  ;;  %v1896_v23 = vadd.f32 %v1833_v61, %v1673_v20 }
 0x4f3   : > { %v1899_v26 = vadd.f32 %v2747_v48, %v1684_v8  ;;  %v4072_v31 = vmul.f32 %v4066_v19, %v1898_v14 }
 0x4f4   : > { %v1897_v33 = vadd.f32 %v1836_v49, %v1676_v22  ;;  %v4080_v36 = vmul.f32 %v4066_v19, %v1896_v23 }
 0x4f5   : > { %1940 = vadd.xlane.f32.xlu0 %v4072_v31  ;;  %v4088_v46 = vmul.f32 %v4066_v19, %v1899_v26 }
 0x4f6   : > { %v2718_v21 = vpop.f32.mrb[4].mxu1  ;;  %v4076_v0 = vmul.f32 %v4066_v19, %v1897_v33 }
 0x4f7   : > { %v1697_v24 = vadd.f32 %v2718_v21, %v4062_v28  ;;  %v1688_v41 = vpop.f32.mrb[5].mxu1 }
 0x4f8   : > { %v1689_v37 = vadd.f32 %v4062_v28, %v1688_v41  ;;  %v2719_v38 = vpop.f32.mrb[6].mxu1  ;;  %1938 = vadd.xlane.f32.xlu1 %v4076_v0 }
 0x4f9   : > { %v1700_v39 = vadd.f32 %v2719_v38, %v4062_v28  ;;  %v1902_v18 = vadd.f32 %v2750_v13, %v1697_v24  ;;  %v1691_v42 = vpop.f32.mrb[7].mxu1  ;;  %1936 = vadd.xlane.f32.xlu0 %v4080_v36 }
 0x4fa   : > { %v1692_v27 = vadd.f32 %v4062_v28, %v1691_v42  ;;  %v1900_v9 = vadd.f32 %v1849_v15, %v1689_v37 }
 0x4fb   : > { %v1903_v44 = vadd.f32 %v2751_v7, %v1700_v39  ;;  %v4091_v47 = vmul.f32 %v4066_v19, %v1902_v18 }
 0x4fc   : > { %v1901_v51 = vadd.f32 %v1852_v16, %v1692_v27  ;;  %v4096_v53 = vmul.f32 %v4066_v19, %v1900_v9 }
 0x4fd   : > { %1942 = vadd.xlane.f32.xlu0 %v4088_v46  ;;  %1948 = vadd.xlane.f32.xlu1 %v4091_v47  ;;  %v4099_v30 = vmul.f32 %v4066_v19, %v1903_v44 }
 0x4fe   : > { %v4104_v34 = vmul.f32 %v4066_v19, %v1901_v51 }
 0x501   : > { %1944 = vadd.xlane.f32.xlu1 %v4096_v53  ;;  %1950 = vadd.xlane.f32.xlu0 %v4099_v30 }
 0x505   : > { %1946 = vadd.xlane.f32.xlu0 %v4104_v34 }
 0x50e   : > { %v2754_v55 = vpop.f32.mrb[8].mxu1 }
 0x50f   : > { %v2840_v56 = vadd.f32 %v2754_v55, %v4062_v28  ;;  %v1865_v25 = vpop.f32.mrb[9].mxu1 }
 0x510   : > { %v2755_v57 = vpop.f32.mrb[10].mxu1  ;;  %v2841_v58 = vadd.f32 %v4062_v28, %v1865_v25 }
 0x511   : > { %v2842_v59 = vadd.f32 %v2755_v57, %v4062_v28  ;;  %v1868_v60 = vpop.f32.mrb[11].mxu1  ;;  %v4111_v62 = vmul.f32 %v2840_v56, %v4066_v19 }
 0x512   : > { %v2843_v63 = vadd.f32 %v4062_v28, %v1868_v60  ;;  %v4120_v1 = vmul.f32 %v2841_v58, %v4066_v19 }
 0x513   : > { %1956 = vadd.xlane.f32.xlu1 %v4111_v62  ;;  %v4116_v52 = vmul.f32 %v2842_v59, %v4066_v19 }
 0x514   : > { %v4124_v4 = vmul.f32 %v2843_v63, %v4066_v19 }
 0x515   : > { %1958 = vadd.xlane.f32.xlu0 %v4116_v52 }
 0x516   : > { %v2758_v43 = vpop.f32.mrb[12].mxu1 }
 0x517   : > { %1952 = vadd.xlane.f32.xlu1 %v4120_v1  ;;  %v1881_v45 = vpop.f32.mrb[13].mxu1  ;;  %v2844_v12 = vadd.f32 %v2758_v43, %v4062_v28 }
 0x518   : > { %v2845_v5 = vadd.f32 %v4062_v28, %v1881_v45  ;;  %v2759_v6 = vpop.f32.mrb[14].mxu1 }
 0x519   : > { %1954 = vadd.xlane.f32.xlu0 %v4124_v4  ;;  %v1884_v10 = vpop.f32.mrb[15].mxu1  ;;  %v2846_v61 = vadd.f32 %v2759_v6, %v4062_v28  ;;  %v4140_v49 = vmul.f32 %v2844_v12, %v4066_v19 }
 0x51a   : > { %v2847_v2 = vadd.f32 %v4062_v28, %v1884_v10  ;;  %v4131_v35 = vmul.f32 %v2845_v5, %v4066_v19 }
 0x51b   : > { %v4144_v13 = vmul.f32 %v2846_v61, %v4066_v19 }
 0x51c   : > { %1960 = vadd.xlane.f32.xlu1 %v4131_v35  ;;  %v4136_v48 = vmul.f32 %v2847_v2, %v4066_v19 }
 0x51e   : > { %1962 = vadd.xlane.f32.xlu0 %v4136_v48 }
 0x520   : > { %1964 = vadd.xlane.f32.xlu1 %v4140_v49 }
 0x522   : > { %1966 = vadd.xlane.f32.xlu0 %v4144_v13 }
 0x582   : > { %v1941_v15 = vpop.xlane.xlu0 %1940 }
 0x583   : > { %v1970_v7 = vmul.f32 0.03125, %v1941_v15 }
 0x585   : > { %v1986_v16 = vsub.f32 %v4072_v31, %v1970_v7  ;;  %v1939_v40 = vpop.xlane.xlu1 %1938 }
 0x586   : > { %v1937_v3 = vpop.xlane.xlu0 %1936  ;;  %v1969_v50 = vmul.f32 0.03125, %v1939_v40 }
 0x587   : > { %v1968_v17 = vmul.f32 0.03125, %v1937_v3  ;;  %v4149_v28 = vmul.f32 %v1986_v16, %v4066_v19 }
 0x588   : > { %v1985_v22 = vsub.f32 %v4076_v0, %v1969_v50 }
 0x589   : > { %v1984_v54 = vsub.f32 %v4080_v36, %v1968_v17  ;;  %v2018_v11 = vmul.f32 %v4149_v28, %v4149_v28 }
 0x58a   : > { %v1943_v20 = vpop.xlane.xlu0 %1942  ;;  %v1949_v29 = vpop.xlane.xlu1 %1948  ;;  %v4169_v0 = vmul.f32 %v1985_v22, %v4066_v19 }
 0x58b   : > { %v1971_v8 = vmul.f32 0.03125, %v1943_v20  ;;  %v1974_v14 = vmul.f32 0.03125, %v1949_v29  ;;  %2036 = vadd.xlane.f32.xlu1 %v2018_v11  ;;  %v4155_v32 = vmul.f32 %v1984_v54, %v4066_v19 }
 0x58c   : > { %v2017_v51 = vmul.f32 %v4169_v0, %v4169_v0 }
 0x58d   : > { %v1987_v23 = vsub.f32 %v4088_v46, %v1971_v8  ;;  %v1990_v26 = vsub.f32 %v4091_v47, %v1974_v14  ;;  %v2016_v31 = vmul.f32 %v4155_v32, %v4155_v32 }
 0x58e   : > { %v1945_v33 = vpop.xlane.xlu1 %1944  ;;  %v1951_v21 = vpop.xlane.xlu0 %1950 }
 0x58f   : > { %v1972_v24 = vmul.f32 0.03125, %v1945_v33  ;;  %v1975_v41 = vmul.f32 0.03125, %v1951_v21  ;;  %2032 = vadd.xlane.f32.xlu1 %v2016_v31  ;;  %v4163_v36 = vmul.f32 %v1990_v26, %v4066_v19  ;;  %v4166_v37 = vmul.f32 %v1987_v23, %v4066_v19 }
 0x591   : > { %v1988_v38 = vsub.f32 %v4096_v53, %v1972_v24  ;;  %v1991_v39 = vsub.f32 %v4099_v30, %v1975_v41  ;;  %v2022_v18 = vmul.f32 %v4163_v36, %v4163_v36  ;;  %v2019_v42 = vmul.f32 %v4166_v37, %v4166_v37 }
 0x592   : > { %v1947_v27 = vpop.xlane.xlu0 %1946 }
 0x593   : > { %v1973_v9 = vmul.f32 0.03125, %v1947_v27  ;;  %2044 = vadd.xlane.f32.xlu1 %v2022_v18  ;;  %2038 = vadd.xlane.f32.xlu0 %v2019_v42  ;;  %v4178_v44 = vmul.f32 %v1988_v38, %v4066_v19  ;;  %v4186_v53 = vmul.f32 %v1991_v39, %v4066_v19 }
 0x595   : > { %v1989_v46 = vsub.f32 %v4104_v34, %v1973_v9  ;;  %v2020_v47 = vmul.f32 %v4178_v44, %v4178_v44  ;;  %v2023_v30 = vmul.f32 %v4186_v53, %v4186_v53 }
 0x597   : > { %2040 = vadd.xlane.f32.xlu1 %v2020_v47  ;;  %2034 = vadd.xlane.f32.xlu0 %v2017_v51  ;;  %v4191_v55 = vmul.f32 %v1989_v46, %v4066_v19 }
 0x599   : > { %v2021_v34 = vmul.f32 %v4191_v55, %v4191_v55 }
 0x59b   : > { %2046 = vadd.xlane.f32.xlu0 %v2023_v30 }
 0x59f   : > { %2042 = vadd.xlane.f32.xlu0 %v2021_v34 }
 0x5a0   : > { %v1957_v56 = vpop.xlane.xlu1 %1956 }
 0x5a1   : > { %v1978_v25 = vmul.f32 0.03125, %v1957_v56 }
 0x5a2   : > { %v1959_v57 = vpop.xlane.xlu0 %1958 }
 0x5a3   : > { %v1994_v58 = vsub.f32 %v4111_v62, %v1978_v25  ;;  %v1979_v59 = vmul.f32 0.03125, %v1959_v57  ;;  %v4248_v25 = vld [vmem:[%s707_s22] ss:$0 sm:$0xff] }
 0x5a4   : > { %v1953_v60 = vpop.xlane.xlu1 %1952 }
 0x5a5   : > { %v1995_v63 = vsub.f32 %v4116_v52, %v1979_v59  ;;  %v1976_v43 = vmul.f32 0.03125, %v1953_v60  ;;  %v4198_v45 = vmul.f32 %v1994_v58, %v4066_v19 }
 0x5a6   : > { %v1955_v5 = vpop.xlane.xlu0 %1954 }
 0x5a7   : > { %v1992_v6 = vsub.f32 %v4120_v1, %v1976_v43  ;;  %v1977_v10 = vmul.f32 0.03125, %v1955_v5  ;;  %v2026_v12 = vmul.f32 %v4198_v45, %v4198_v45  ;;  %v4204_v2 = vmul.f32 %v1995_v63, %v4066_v19  ;;  %v4256_v63 = vld [vmem:[%s710_s4] ss:$0 sm:$0xff] }
 0x5a9   : > { %v1993_v62 = vsub.f32 %v4124_v4, %v1977_v10  ;;  %2052 = vadd.xlane.f32.xlu1 %v2026_v12  ;;  %v1961_v61 = vpop.xlane.xlu1 %1960  ;;  %v2027_v52 = vmul.f32 %v4204_v2, %v4204_v2  ;;  %v4210_v15 = vmul.f32 %v1992_v6, %v4066_v19 }
 0x5aa   : > { %v1980_v7 = vmul.f32 0.03125, %v1961_v61 }
 0x5ab   : > { %2054 = vadd.xlane.f32.xlu0 %v2027_v52  ;;  %v1963_v1 = vpop.xlane.xlu0 %1962  ;;  %v2024_v16 = vmul.f32 %v4210_v15, %v4210_v15  ;;  %v4215_v40 = vmul.f32 %v1993_v62, %v4066_v19 }
 0x5ac   : > { %v1996_v3 = vsub.f32 %v4131_v35, %v1980_v7  ;;  %v1981_v4 = vmul.f32 0.03125, %v1963_v1 }
 0x5ad   : > { %2048 = vadd.xlane.f32.xlu1 %v2024_v16  ;;  %v1965_v17 = vpop.xlane.xlu1 %1964  ;;  %v2025_v50 = vmul.f32 %v4215_v40, %v4215_v40 }
 0x5ae   : > { %v1997_v54 = vsub.f32 %v4136_v48, %v1981_v4  ;;  %v1982_v11 = vmul.f32 0.03125, %v1965_v17  ;;  %v4222_v20 = vmul.f32 %v1996_v3, %v4066_v19 }
 0x5af   : > { %2050 = vadd.xlane.f32.xlu0 %v2025_v50  ;;  %v1967_v29 = vpop.xlane.xlu0 %1966 }
 0x5b0   : > { %v1998_v8 = vsub.f32 %v4140_v49, %v1982_v11  ;;  %v1983_v14 = vmul.f32 0.03125, %v1967_v29  ;;  %v2028_v35 = vmul.f32 %v4222_v20, %v4222_v20  ;;  %v4228_v22 = vmul.f32 %v1997_v54, %v4066_v19 }
 0x5b2   : > { %v1999_v23 = vsub.f32 %v4144_v13, %v1983_v14  ;;  %2056 = vadd.xlane.f32.xlu1 %v2028_v35  ;;  %v2029_v48 = vmul.f32 %v4228_v22, %v4228_v22  ;;  %v4234_v26 = vmul.f32 %v1998_v8, %v4066_v19 }
 0x5b4   : > { %2058 = vadd.xlane.f32.xlu0 %v2029_v48  ;;  %v2030_v49 = vmul.f32 %v4234_v26, %v4234_v26  ;;  %v4239_v31 = vmul.f32 %v1999_v23, %v4066_v19 }
 0x5b6   : > { %2060 = vadd.xlane.f32.xlu1 %v2030_v49  ;;  %v2031_v33 = vmul.f32 %v4239_v31, %v4239_v31 }
 0x5b8   : > { %2062 = vadd.xlane.f32.xlu0 %v2031_v33  ;;  %v2215_v33 = vld [vmem:[%s4488_s23 + $0x30] sm:$0xff] }
 0x618   : > { %v2037_v13 = vpop.xlane.xlu1 %2036 }
 0x619   : > { %v2066_v21 = vmul.f32 0.03125, %v2037_v13 }
 0x61b   : > { %v2082_v24 = vadd.f32 1e-05, %v2066_v21 }
 0x61c   : > { %v2033_v41 = vpop.xlane.xlu1 %2032 }
 0x61d   : > { %3011 = vrsqrt.f32 %v2082_v24  ;;  %v2064_v38 = vmul.f32 0.03125, %v2033_v41  ;;  %v2212_v24 = vld [vmem:[%s4488_s23 + $0x18] sm:$0xff] }
 0x61f   : > { %v2080_v39 = vadd.f32 1e-05, %v2064_v38 }
 0x620   : > { %v2045_v18 = vpop.xlane.xlu1 %2044  ;;  %v2039_v42 = vpop.xlane.xlu0 %2038 }
 0x621   : > { %3013 = vrsqrt.f32 %v2080_v39  ;;  %v2070_v27 = vmul.f32 0.03125, %v2045_v18  ;;  %v2067_v19 = vmul.f32 0.03125, %v2039_v42 }
 0x623   : > { %v2086_v9 = vadd.f32 1e-05, %v2070_v27  ;;  %v2083_v46 = vadd.f32 1e-05, %v2067_v19 }
 0x624   : > { %v2041_v47 = vpop.xlane.xlu1 %2040  ;;  %v2035_v51 = vpop.xlane.xlu0 %2034 }
 0x625   : > { %3015 = vrsqrt.f32 %v2086_v9  ;;  %v2068_v30 = vmul.f32 0.03125, %v2041_v47  ;;  %v2065_v34 = vmul.f32 0.03125, %v2035_v51  ;;  %v2213_v51 = vld [vmem:[%s4488_s23 + $0x20] sm:$0xff] }
 0x626   : > { %3017 = vrsqrt.f32 %v2083_v46 }
 0x627   : > { %v3012_v56 = vpop.eup %3011  ;;  %v2084_v57 = vadd.f32 1e-05, %v2068_v30  ;;  %v2081_v58 = vadd.f32 1e-05, %v2065_v34 }
 0x628   : > { %v2114_v59 = vmul.f32 %v3012_v56, %v4149_v28  ;;  %v2047_v60 = vpop.xlane.xlu0 %2046  ;;  %v2211_v28 = vld [vmem:[%s4488_s23 + $0x10] sm:$0xff] }
 0x629   : > { %3019 = vrsqrt.f32 %v2084_v57  ;;  %v2071_v43 = vmul.f32 0.03125, %v2047_v60  ;;  %v2210_v57 = vld [vmem:[%s4488_s23 + $0x8] sm:$0xff] }
 0x62a   : > { %v2136_v5 = vmul.f32 %v4248_v25, %v2114_v59  ;;  %3021 = vrsqrt.f32 %v2081_v58 }
 0x62b   : > { %v3014_v6 = vpop.eup %3013  ;;  %v2087_v10 = vadd.f32 1e-05, %v2071_v43 }
 0x62c   : > { %v2158_v12 = vadd.f32 %v4256_v63, %v2136_v5  ;;  %v2112_v62 = vmul.f32 %v3014_v6, %v4155_v32  ;;  %v2043_v61 = vpop.xlane.xlu0 %2042  ;;  %v2209_v32 = vld [vmem:[%s4488_s23] sm:$0xff] }
 0x62d   : > { %3023 = vrsqrt.f32 %v2087_v10  ;;  %v2069_v52 = vmul.f32 0.03125, %v2043_v61 }
 0x62e   : > { %v2174_v7 = vmax.f32 %v2158_v12, 0.0  ;;  %v2134_v1 = vmul.f32 %v4248_v25, %v2112_v62 }
 0x62f   : > { %v3016_v16 = vpop.eup %3015  ;;  %v2085_v3 = vadd.f32 1e-05, %v2069_v52 }
 0x630   : > { %v3018_v4 = vpop.eup %3017  ;;  %v2227_v17 = vadd.f32 %v2211_v28, %v2174_v7  ;;  %v2156_v50 = vadd.f32 %v4256_v63, %v2134_v1  ;;  %v2118_v54 = vmul.f32 %v3016_v16, %v4163_v36 }
 0x631   : > { %v2115_v11 = vmul.f32 %v3018_v4, %v4166_v37  ;;  %3025 = vrsqrt.f32 %v2085_v3 }
 0x632   : > { %2243 = vst [vmem:[#allocation13 + $0x10] sm:$0xff] %v2227_v17  ;;  %v2172_v29 = vmax.f32 %v2156_v50, 0.0  ;;  %v2140_v8 = vmul.f32 %v4248_v25, %v2118_v54 }
 0x633   : > { %v3020_v14 = vpop.eup %3019  ;;  %v2137_v35 = vmul.f32 %v4248_v25, %v2115_v11 }
 0x634   : > { %v3022_v23 = vpop.eup %3021  ;;  %v2225_v48 = vadd.f32 %v2209_v32, %v2172_v29  ;;  %v2162_v49 = vadd.f32 %v4256_v63, %v2140_v8  ;;  %v2116_v36 = vmul.f32 %v3020_v14, %v4178_v44 }
 0x635   : > { %v2159_v37 = vadd.f32 %v4256_v63, %v2137_v35  ;;  %v2113_v13 = vmul.f32 %v3022_v23, %v4169_v0 }
 0x636   : > { %2241 = vst [vmem:[#allocation13] sm:$0xff] %v2225_v48  ;;  %v2178_v21 = vmax.f32 %v2162_v49, 0.0  ;;  %v2138_v41 = vmul.f32 %v4248_v25, %v2116_v36  ;;  %v2053_v38 = vpop.xlane.xlu1 %2052 }
 0x637   : > { %v3024_v39 = vpop.eup %3023  ;;  %v2175_v44 = vmax.f32 %v2159_v37, 0.0  ;;  %v2135_v18 = vmul.f32 %v4248_v25, %v2113_v13  ;;  %v2074_v42 = vmul.f32 0.03125, %v2053_v38 }
 0x638   : > { %v2231_v27 = vadd.f32 %v2215_v33, %v2178_v21  ;;  %v2160_v19 = vadd.f32 %v4256_v63, %v2138_v41  ;;  %v2119_v9 = vmul.f32 %v3024_v39, %v4186_v53  ;;  %v2055_v0 = vpop.xlane.xlu0 %2054 }
 0x639   : > { %v2189_v46 = vpack.c.bf16 %v2175_v44, %v2174_v7  ;;  %v2228_v47 = vadd.f32 %v2212_v24, %v2175_v44  ;;  %v2157_v30 = vadd.f32 %v4256_v63, %v2135_v18  ;;  %v2090_v34 = vadd.f32 1e-05, %v2074_v42  ;;  %v2216_v7 = vld [vmem:[%s4488_s23 + $0x38] sm:$0xff] }
 0x63a   : > { %2247 = vst [vmem:[#allocation13 + $0x30] sm:$0xff] %v2231_v27  ;;  %v2176_v56 = vmax.f32 %v2160_v19, 0.0  ;;  %v2141_v58 = vmul.f32 %v4248_v25, %v2119_v9  ;;  %v2075_v59 = vmul.f32 0.03125, %v2055_v0  ;;  %v2049_v53 = vpop.xlane.xlu1 %2048 }
 0x63b   : > { %v3026_v60 = vpop.eup %3025  ;;  %2202 = vst [vmem:[%s4296_s20 + $0x8] sm:$0xff] %v2189_v46  ;;  %2244 = vst [vmem:[#allocation13 + $0x18] sm:$0xff] %v2228_v47  ;;  %v2173_v43 = vmax.f32 %v2157_v30, 0.0  ;;  %3027 = vrsqrt.f32 %v2090_v34  ;;  %v2072_v5 = vmul.f32 0.03125, %v2049_v53  ;;  %v2217_v53 = vld [vmem:[%s4488_s23 + $0x40] sm:$0xff] }
 0x63c   : > { %v2229_v6 = vadd.f32 %v2213_v51, %v2176_v56  ;;  %v2163_v10 = vadd.f32 %v4256_v63, %v2141_v58  ;;  %v2117_v12 = vmul.f32 %v3026_v60, %v4191_v55  ;;  %v2091_v62 = vadd.f32 1e-05, %v2075_v59  ;;  %v2051_v61 = vpop.xlane.xlu0 %2050 }
 0x63d   : > { %v2188_v28 = vpack.c.bf16 %v2173_v43, %v2172_v29  ;;  %v2226_v52 = vadd.f32 %v2210_v57, %v2173_v43  ;;  %v2088_v1 = vadd.f32 1e-05, %v2072_v5  ;;  %v2073_v16 = vmul.f32 0.03125, %v2051_v61  ;;  %v2214_v29 = vld [vmem:[%s4488_s23 + $0x28] sm:$0xff] }
 0x63e   : > { %2245 = vst [vmem:[#allocation13 + $0x20] sm:$0xff] %v2229_v6  ;;  %v2179_v3 = vmax.f32 %v2163_v10, 0.0  ;;  %v2139_v4 = vmul.f32 %v4248_v25, %v2117_v12  ;;  %3029 = vrsqrt.f32 %v2091_v62  ;;  %v2218_v12 = vld [vmem:[%s4488_s23 + $0x48] sm:$0xff] }
 0x63f   : > { %2201 = vst [vmem:[%s4296_s20] sm:$0xff] %v2188_v28  ;;  %2242 = vst [vmem:[#allocation13 + $0x8] sm:$0xff] %v2226_v52  ;;  %3031 = vrsqrt.f32 %v2088_v1  ;;  %v2089_v55 = vadd.f32 1e-05, %v2073_v16  ;;  %v2057_v17 = vpop.xlane.xlu1 %2056 }
 0x640   : > { %v2191_v50 = vpack.c.bf16 %v2179_v3, %v2178_v21  ;;  %v2232_v54 = vadd.f32 %v2216_v7, %v2179_v3  ;;  %v2161_v32 = vadd.f32 %v4256_v63, %v2139_v4  ;;  %v2076_v11 = vmul.f32 0.03125, %v2057_v17 }
 0x641   : > { %3033 = vrsqrt.f32 %v2089_v55  ;;  %v2059_v8 = vpop.xlane.xlu0 %2058  ;;  %v2221_v55 = vld [vmem:[%s4488_s23 + $0x60] sm:$0xff] }
 0x642   : > { %2204 = vst [vmem:[%s4296_s20 + $0x18] sm:$0xff] %v2191_v50  ;;  %2248 = vst [vmem:[#allocation13 + $0x38] sm:$0xff] %v2232_v54  ;;  %v2177_v14 = vmax.f32 %v2161_v32, 0.0  ;;  %v2092_v35 = vadd.f32 1e-05, %v2076_v11  ;;  %v2077_v23 = vmul.f32 0.03125, %v2059_v8 }
 0x643   : > { %v2061_v48 = vpop.xlane.xlu1 %2060  ;;  %v2222_v32 = vld [vmem:[%s4488_s23 + $0x68] sm:$0xff] }
 0x644   : > { %v2190_v49 = vpack.c.bf16 %v2177_v14, %v2176_v56  ;;  %v2230_v36 = vadd.f32 %v2214_v29, %v2177_v14  ;;  %3035 = vrsqrt.f32 %v2092_v35  ;;  %v2093_v33 = vadd.f32 1e-05, %v2077_v23 }
 0x645   : > { %v3028_v37 = vpop.eup %3027  ;;  %v2078_v13 = vmul.f32 0.03125, %v2061_v48  ;;  %v2063_v21 = vpop.xlane.xlu0 %2062 }
 0x646   : > { %2203 = vst [vmem:[%s4296_s20 + $0x10] sm:$0xff] %v2190_v49  ;;  %2246 = vst [vmem:[#allocation13 + $0x28] sm:$0xff] %v2230_v36  ;;  %v2122_v24 = vmul.f32 %v3028_v37, %v4198_v45  ;;  %3037 = vrsqrt.f32 %v2093_v33  ;;  %v2079_v41 = vmul.f32 0.03125, %v2063_v21  ;;  %v2219_v45 = vld [vmem:[%s4488_s23 + $0x50] sm:$0xff] }
 0x647   : > { %v2094_v38 = vadd.f32 1e-05, %v2078_v13 }
 0x648   : > { %v3030_v39 = vpop.eup %3029  ;;  %v2144_v44 = vmul.f32 %v4248_v25, %v2122_v24  ;;  %v2095_v18 = vadd.f32 1e-05, %v2079_v41 }
 0x649   : > { %v3032_v42 = vpop.eup %3031  ;;  %v2123_v27 = vmul.f32 %v3030_v39, %v4204_v2  ;;  %3039 = vrsqrt.f32 %v2094_v38 }
 0x64a   : > { %v2166_v19 = vadd.f32 %v4256_v63, %v2144_v44  ;;  %v2120_v9 = vmul.f32 %v3032_v42, %v4210_v15  ;;  %3041 = vrsqrt.f32 %v2095_v18  ;;  %v2220_v15 = vld [vmem:[%s4488_s23 + $0x58] sm:$0xff] }
 0x64b   : > { %v3034_v0 = vpop.eup %3033  ;;  %v2145_v46 = vmul.f32 %v4248_v25, %v2123_v27 }
 0x64c   : > { %v2182_v47 = vmax.f32 %v2166_v19, 0.0  ;;  %v2142_v51 = vmul.f32 %v4248_v25, %v2120_v9  ;;  %v2121_v30 = vmul.f32 %v3034_v0, %v4215_v40 }
 0x64d   : > { %v2167_v2 = vadd.f32 %v4256_v63, %v2145_v46 }
 0x64e   : > { %v3036_v34 = vpop.eup %3035  ;;  %v2235_v56 = vadd.f32 %v2219_v45, %v2182_v47  ;;  %v2164_v57 = vadd.f32 %v4256_v63, %v2142_v51  ;;  %v2143_v58 = vmul.f32 %v4248_v25, %v2121_v30 }
 0x64f   : > { %v2183_v59 = vmax.f32 %v2167_v2, 0.0  ;;  %v2124_v40 = vmul.f32 %v3036_v34, %v4222_v20 }
 0x650   : > { %v3038_v60 = vpop.eup %3037  ;;  %2251 = vst [vmem:[#allocation13 + $0x50] sm:$0xff] %v2235_v56  ;;  %v2180_v43 = vmax.f32 %v2164_v57, 0.0  ;;  %v2165_v5 = vadd.f32 %v4256_v63, %v2143_v58 }
 0x651   : > { %v2193_v6 = vpack.c.bf16 %v2183_v59, %v2182_v47  ;;  %v2236_v10 = vadd.f32 %v2220_v15, %v2183_v59  ;;  %v2146_v62 = vmul.f32 %v4248_v25, %v2124_v40  ;;  %v2125_v61 = vmul.f32 %v3038_v60, %v4228_v22 }
 0x652   : > { %v2233_v28 = vadd.f32 %v2217_v53, %v2180_v43  ;;  %v2181_v52 = vmax.f32 %v2165_v5, 0.0 }
 0x653   : > { %v3040_v7 = vpop.eup %3039  ;;  %2206 = vst [vmem:[%s4296_s20 + $0x28] sm:$0xff] %v2193_v6  ;;  %2252 = vst [vmem:[#allocation13 + $0x58] sm:$0xff] %v2236_v10  ;;  %v2168_v20 = vadd.f32 %v4256_v63, %v2146_v62  ;;  %v2147_v1 = vmul.f32 %v4248_v25, %v2125_v61 }
 0x654   : > { %v3042_v16 = vpop.eup %3041  ;;  %2249 = vst [vmem:[#allocation13 + $0x40] sm:$0xff] %v2233_v28  ;;  %v2192_v3 = vpack.c.bf16 %v2181_v52, %v2180_v43  ;;  %v2234_v4 = vadd.f32 %v2218_v12, %v2181_v52  ;;  %v2126_v22 = vmul.f32 %v3040_v7, %v4234_v26 }
 0x655   : > { %v2184_v17 = vmax.f32 %v2168_v20, 0.0  ;;  %v2169_v50 = vadd.f32 %v4256_v63, %v2147_v1  ;;  %v2127_v54 = vmul.f32 %v3042_v16, %v4239_v31  ;;  %v2223_v31 = vld [vmem:[%s4488_s23 + $0x70] sm:$0xff] }
 0x656   : > { %2205 = vst [vmem:[%s4296_s20 + $0x20] sm:$0xff] %v2192_v3  ;;  %2250 = vst [vmem:[#allocation13 + $0x48] sm:$0xff] %v2234_v4  ;;  %v2148_v11 = vmul.f32 %v4248_v25, %v2126_v22 }
 0x657   : > { %v2237_v29 = vadd.f32 %v2221_v55, %v2184_v17  ;;  %v2185_v8 = vmax.f32 %v2169_v50, 0.0  ;;  %v2149_v14 = vmul.f32 %v4248_v25, %v2127_v54  ;;  %v2224_v25 = vld [vmem:[%s4488_s23 + $0x78] sm:$0xff] }
 0x658   : > { %v2170_v26 = vadd.f32 %v4256_v63, %v2148_v11 }
 0x659   : > { %2253 = vst [vmem:[#allocation13 + $0x60] sm:$0xff] %v2237_v29  ;;  %v2194_v35 = vpack.c.bf16 %v2185_v8, %v2184_v17  ;;  %v2238_v23 = vadd.f32 %v2222_v32, %v2185_v8  ;;  %v2171_v48 = vadd.f32 %v4256_v63, %v2149_v14 }
 0x65a   : > { %v2186_v49 = vmax.f32 %v2170_v26, 0.0 }
 0x65b   : > { %2207 = vst [vmem:[%s4296_s20 + $0x30] sm:$0xff] %v2194_v35  ;;  %2254 = vst [vmem:[#allocation13 + $0x68] sm:$0xff] %v2238_v23  ;;  %v2187_v36 = vmax.f32 %v2171_v48, 0.0 }
 0x65c   : > { %v2239_v33 = vadd.f32 %v2223_v31, %v2186_v49 }
 0x65d   : > { %v2195_v37 = vpack.c.bf16 %v2187_v36, %v2186_v49  ;;  %v2240_v13 = vadd.f32 %v2224_v25, %v2187_v36 }
 0x65e   : > { %2255 = vst [vmem:[#allocation13 + $0x70] sm:$0xff] %v2239_v33 }
 0x65f   : > { %2208 = vst [vmem:[%s4296_s20 + $0x38] sm:$0xff] %v2195_v37  ;;  %2256 = vst [vmem:[#allocation13 + $0x78] sm:$0xff] %v2240_v13 }
 0x660   : > { %3200 = shalt.err (!%p3197_p4)
}
 0x661   : > { %s4489_s26 = sld [smem:[#allocation32_spill]] }
 0x667   : > { %s3201_s24 = scalar_lea.hbm %s4489_s26, 2048 }
 0x668   : > { %p3202_p5 = scmp.ne.s32.totalorder %s4489_s26, %s3201_s24  ;;  %p3207_p9 = scmp.lt.u32.totalorder %s3201_s24, %s4489_s26 }
 0x66a   : > { %p3203_p12 = pnand %p3202_p5, %p2900_p0 }
 0x66c   : > { %p3204_p3 = pneg %p3203_p12 }
 0x66e   : > { %p3209_p8 = pnand %p3207_p9, %p3204_p3 }
 0x670   : > { %3212 = shalt.err (!%p3209_p8)
}
 0x671   : > { %s3288_s14 = smov 128   ;;  %s3289_s4 = smov 8  }
 0x672   : > { %2873 = dma.vmem_to_hbm [thread:$0]  (%p2900_p0), %s2267_s16, 2048, %s4489_s26, [#allocation6], %s3288_s14, %s3288_s14, %s3289_s4  }
 0x673   : > { %3250 = dma.done.wait (%p2900_p0), [#allocation6], 2048  }
 0x674   : > { %3252 = vsyncadd (%p2900_p0), [#allocation6], 4294965248 }
 0x675 PF: > { %s32_s18 = sadd.s32 1, %s3275_s18   ;;  %s4490_s27 = sld [smem:[#allocation18_spill]] }
 0x676   : > { %p29_p7 = scmp.ge.s32.totalorder %s32_s18, 4   ;;  %s4491_s15 = sld [smem:[#allocation20_spill]] }
 0x677   : > { %s4492_s7 = sld [smem:[#allocation19_spill]]  ;;  %s4493_s29 = smov %s3259_s30 }
 0x678   : > { %s4495_s16 = smov %s3271_s17  ;;  %31 = sbr.rel (!%p29_p7) target bundleno = 21 (0x15), region = 178 }
 0x67b   : > { %s4494_s30 = smov %s4490_s27 }
 0x67d   : > { %s4496_s17 = smov %s4492_s7 }
 0x67f   :  { %2282 = vsyncpa [#allocation5], 1 }
 0x680   :  { %2284 = vsyncpa [#allocation5 + $0x1], 1 }
 0x681   :  { %2285 = vsyncpa [#allocation8], 1 }
 0x682   :  { %2286 = vsyncpa [#allocation11], 1 }
 0x683   :  { %2288 = vsyncpa [#allocation11 + $0x1], 1 }
 0x684   :  { %2289 = vsyncpa [#allocation6], 1 }
 0x685   :  { %2291 = vsyncpa [#allocation6 + $0x1], 1 }

</bundles_post_ra>
